<compile_context>
chip_gen: v7x
topology: tpu7x:2x2x1
jax: 0.10.0
libtpu: 0.0.40
codegen_flags: <defaults>
</compile_context>

<pallas_src>
import functools
import math

import jax
import jax.numpy as jnp
from jax.experimental import pallas as pl
from jax.experimental.pallas import tpu as pltpu


def _encoder_layer_kernel(
    xf_ref,                     # (1, S, E)   f32   full sequence (resident per b)
    wq_ref, bq_ref,             # (E, E) bf16, (1, E) f32
    wkv_ref, bkv_ref,           # (E, 2E) bf16, (1, 2E) f32   [Wk | Wv]
    wo_ref, bo_ref,             # (E, E) bf16, (1, E) f32
    w1_ref, b1_ref,             # (E, FF) bf16, (1, FF) f32
    w2_ref, b2_ref,             # (FF, E) bf16, (1, E) f32
    g1_ref, be1_ref,            # (1, E) f32   LayerNorm1 gamma / beta
    g2_ref, be2_ref,            # (1, E) f32   LayerNorm2 gamma / beta
    out_ref,                    # (1, TQ, E)  f32
    *rest,                      # [attn_ref (1, TQ, S)] + (kv_scr, ctx_scr)
    num_heads, need_weights, activation, eps=1e-5,
):
    if need_weights:
        attn_ref, kv_scr, ctx_scr = rest
    else:
        kv_scr, ctx_scr = rest

    bf16, f32 = jnp.bfloat16, jnp.float32
    H = num_heads
    S, E = xf_ref.shape[1], xf_ref.shape[2]
    TQ = out_ref.shape[1]
    Dh = E // H
    scale = 1.0 / math.sqrt(Dh)
    qi = pl.program_id(1)

    # ---- K|V projection: ONE full-width (S, E) @ (E, 2E) GEMM per batch ----
    # element (chunked by TQ rows so the f32 intermediate stays bounded).
    # Stored as resident bf16 scratch and reused by every query tile.
    @pl.when(qi == 0)
    def _():
        for c in range(S // TQ):                        # static unroll
            rows = slice(c * TQ, (c + 1) * TQ)
            kvc = jnp.dot(xf_ref[0, rows, :].astype(bf16), wkv_ref[...],
                          preferred_element_type=f32)
            kv_scr[rows, :] = (kvc + bkv_ref[...]).astype(bf16)

    # ---- query tile sliced from the resident block (no extra HBM stream) ----
    row0 = pl.multiple_of(qi * TQ, TQ)
    xq_f32 = xf_ref[0, pl.ds(row0, TQ), :]              # (TQ, E) f32

    # ---- Q projection: one full-width (TQ, E) @ (E, E) GEMM ----
    # (PyTorch MHA scales q by 1/sqrt(Dh) after the in-projection bias.)
    q = ((jnp.dot(xq_f32.astype(bf16), wq_ref[...], preferred_element_type=f32)
          + bq_ref[...]) * scale).astype(bf16)          # (TQ, E)

    # ---- attention, one head at a time (bounded f32 temporaries) ----
    attn_sum = None
    for h in range(H):                                  # static unroll
        cols = slice(h * Dh, (h + 1) * Dh)
        q_h = q[:, cols]                                # (TQ, Dh) bf16
        k_h = kv_scr[:, cols]                           # (S, Dh)  bf16
        v_h = kv_scr[:, E + h * Dh:E + (h + 1) * Dh]    # (S, Dh)  bf16
        s_h = jnp.einsum('qd,kd->qk', q_h, k_h,
                         preferred_element_type=f32)    # (TQ, S)
        m = jnp.max(s_h, axis=-1, keepdims=True)
        p = jnp.exp(s_h - m)
        denom = jnp.sum(p, axis=-1, keepdims=True)
        probs = p / denom          # exact: these are the returned attn weights
        if need_weights:
            attn_sum = probs if attn_sum is None else attn_sum + probs
        ctx_h = jnp.dot(probs.astype(bf16), v_h,
                        preferred_element_type=f32)     # (TQ, Dh)
        ctx_scr[:, cols] = ctx_h                        # reassemble (TQ, E)

    if need_weights:
        # PyTorch MHA returns attention weights averaged over heads.
        attn_ref[0] = (attn_sum * (1.0 / H)).astype(attn_ref.dtype)

    # ---- out-projection: single full-depth (TQ, E) @ (E, E) GEMM ----
    attn_out = jnp.dot(ctx_scr[...].astype(bf16), wo_ref[...],
                       preferred_element_type=f32) + bo_ref[...]

    # ---- residual + LayerNorm1 (dropout1 identity in eval mode) ----
    y = xq_f32 + attn_out
    mu = jnp.mean(y, axis=-1, keepdims=True)
    var = jnp.mean((y - mu) ** 2, axis=-1, keepdims=True)
    y = (y - mu) * jax.lax.rsqrt(var + eps) * g1_ref[...] + be1_ref[...]

    # ---- feed-forward: Linear2(act(Linear1(y))) ----
    h1 = jnp.dot(y.astype(bf16), w1_ref[...],
                 preferred_element_type=f32) + b1_ref[...]
    if activation == 'relu':
        h1 = jnp.maximum(h1, 0.0)
    else:                                  # 'gelu' (exact erf form, as torch)
        h1 = jax.nn.gelu(h1, approximate=False)
    h2 = jnp.dot(h1.astype(bf16), w2_ref[...],
                 preferred_element_type=f32) + b2_ref[...]

    # ---- residual + LayerNorm2 ----
    z = y + h2
    mu2 = jnp.mean(z, axis=-1, keepdims=True)
    var2 = jnp.mean((z - mu2) ** 2, axis=-1, keepdims=True)
    out_ref[0] = ((z - mu2) * jax.lax.rsqrt(var2 + eps) * g2_ref[...]
                  + be2_ref[...]).astype(out_ref.dtype)


def _choose_tq(S):
    """Largest query tile dividing S (second-minor kept a multiple of 8),
    bounded so the per-head f32 attention temporaries (~16*TQ*S B) stay ~8 MiB."""
    budget_tq = max(128, (8 << 20) // (16 * max(S, 1)))
    for tq in (512, 256, 128):
        if S % tq == 0 and tq <= budget_tq:
            return tq
    hi = min(S, 512)
    hi -= hi % 8
    for tq in range(hi, 7, -8):
        if S % tq == 0 and tq <= budget_tq:
            return tq
    return S


def _vmem_cap_bytes():
    """Physical VMEM per TensorCore (generation-aware), with a safe fallback."""
    try:
        return int(pltpu.get_tpu_info().vmem_capacity_bytes)
    except Exception:
        return 64 << 20          # conservative (v7x-sized) default


def _pack_params(p):
    """Torch-layout f32 params -> kernel layout (bf16 weights, fused K|V)."""
    wq, wk, wv = jnp.split(p["in_proj_weight"], 3, axis=0)    # (E, E) each
    bq, bk, bv = jnp.split(p["in_proj_bias"], 3)              # (E,)
    t = lambda w: jnp.transpose(w).astype(jnp.bfloat16)       # (out,in)->(in,out)
    row = lambda v: v.reshape(1, -1).astype(jnp.float32)
    return dict(
        wq=t(wq), bq=row(bq),
        wkv=jnp.concatenate([t(wk), t(wv)], axis=1),          # (E, 2E)
        bkv=row(jnp.concatenate([bk, bv])),                   # (1, 2E)
        wo=t(p["out_proj_weight"]), bo=row(p["out_proj_bias"]),
        w1=t(p["linear1_weight"]), b1=row(p["linear1_bias"]),
        w2=t(p["linear2_weight"]), b2=row(p["linear2_bias"]),
        g1=row(p["norm1_weight"]), be1=row(p["norm1_bias"]),
        g2=row(p["norm2_weight"]), be2=row(p["norm2_bias"]),
    )


def transformer_encoder_layer(src, params, num_heads, *, need_weights=True,
                              batch_first=False, activation='relu',
                              attn_dtype=jnp.float32, eps=1e-5):
    """Fused TransformerEncoderLayerCustom forward (eval mode).

    src: (S, B, E) f32 (PyTorch layout); pass batch_first=True for (B, S, E).
    Returns (out in the same layout as src, head-averaged attn (B, S, S) or None).
    """
    if batch_first:
        x = src
        B, S, E = x.shape
    else:
        S, B, E = src.shape
        x = jnp.transpose(src, (1, 0, 2))                     # -> (B, S, E)
    H = num_heads
    assert E % H == 0, "d_model must be divisible by nhead"
    FF = params["linear1_weight"].shape[0]

    pp = _pack_params(params)
    TQ = _choose_tq(S)
    nq = S // TQ

    kernel = functools.partial(_encoder_layer_kernel, num_heads=H,
                               need_weights=need_weights,
                               activation=activation, eps=eps)

    out_shapes = [jax.ShapeDtypeStruct((B, S, E), jnp.float32)]
    out_specs = [pl.BlockSpec((1, TQ, E), lambda b, q: (b, q, 0))]
    if need_weights:
        out_shapes.append(jax.ShapeDtypeStruct((B, S, S), attn_dtype))
        out_specs.append(pl.BlockSpec((1, TQ, S), lambda b, q: (b, q, 0)))

    def run(single_buffer_weights):
        def w_spec(shape):
            nd = len(shape)
            kwargs = {}
            if single_buffer_weights:
                # Constant-index weights never change block index: single-buffer.
                kwargs["pipeline_mode"] = pl.Buffered(1)
            return pl.BlockSpec(shape, lambda b, q: (0,) * nd, **kwargs)

        in_specs = [
            pl.BlockSpec((1, S, E), lambda b, q: (b, 0, 0)),   # xf (resident per b)
            w_spec((E, E)), w_spec((1, E)),                    # wq, bq
            w_spec((E, 2 * E)), w_spec((1, 2 * E)),            # wkv, bkv
            w_spec((E, E)), w_spec((1, E)),                    # wo, bo
            w_spec((E, FF)), w_spec((1, FF)),                  # w1, b1
            w_spec((FF, E)), w_spec((1, E)),                   # w2, b2
            w_spec((1, E)), w_spec((1, E)),                    # g1, be1
            w_spec((1, E)), w_spec((1, E)),                    # g2, be2
        ]

        # --- generation-aware VMEM budget (includes value temporaries) ---
        wbuf = 1 if single_buffer_weights else 2
        weight_bytes = (4 * E * E + 2 * E * FF) * 2            # bf16 matrices
        bias_bytes = (9 * E + FF) * 4                          # f32 vectors
        attn_isz = jnp.dtype(attn_dtype).itemsize
        block_bytes = (2 * S * E * 4                           # xf f32 (x2 buf)
                       + 2 * TQ * E * 4                        # out f32 (x2 buf)
                       + (2 * TQ * S * attn_isz if need_weights else 0))
        scratch_bytes = S * 2 * E * 2 + TQ * E * 4             # K|V bf16 + ctx f32
        temp_bytes = (5 * TQ * S + TQ * FF + 2 * TQ * E + 4 * TQ * E) * 4
        est = (wbuf * (weight_bytes + bias_bytes) + block_bytes
               + scratch_bytes + temp_bytes)
        cap = max(min(_vmem_cap_bytes() - (8 << 20), 112 << 20), 16 << 20)
        vmem_limit = int(min(max(est + (4 << 20), 32 << 20), cap))
        # TODO(synk): configs whose resident K|V + weights exceed `cap` (very
        # long S on v7x's 64 MiB VMEM) would need a kv-tiled flash-style loop.

        return pl.pallas_call(
            kernel,
            out_shape=tuple(out_shapes),
            grid_spec=pltpu.PrefetchScalarGridSpec(
                num_scalar_prefetch=0,
                grid=(B, nq),
                in_specs=in_specs,
                out_specs=out_specs,
                scratch_shapes=[
                    pltpu.VMEM((S, 2 * E), jnp.bfloat16),   # K | V, per batch elem
                    pltpu.VMEM((TQ, E), jnp.float32),       # ctx reassembly
                ],
            ),
            compiler_params=pltpu.CompilerParams(
                # qi is "arbitrary": K|V scratch is reused across query tiles.
                dimension_semantics=("parallel", "arbitrary"),
                vmem_limit_bytes=vmem_limit),
        )(x,
          pp["wq"], pp["bq"], pp["wkv"], pp["bkv"], pp["wo"], pp["bo"],
          pp["w1"], pp["b1"], pp["w2"], pp["b2"],
          pp["g1"], pp["be1"], pp["g2"], pp["be2"])

    try:
        outs = run(True)
    except Exception:
        # pl.Buffered(1) (single-buffered constant blocks) not supported on
        # this jax version: fall back to default double buffering.
        outs = run(False)

    out = outs[0]
    attn = outs[1] if need_weights else None
    if not batch_first:
        out = jnp.transpose(out, (1, 0, 2))                   # back to (S, B, E)
    return out, attn


def _xavier_uniform(key, shape):
    fan_out, fan_in = shape
    bound = math.sqrt(6.0 / (fan_in + fan_out))
    return jax.random.uniform(key, shape, jnp.float32, -bound, bound)


def make_params(key, d_model, dim_feedforward):
    """Parameters in torch layout (weights are (out_features, in_features))."""
    E, FF = d_model, dim_feedforward
    ks = jax.random.split(key, 4)
    zeros = lambda n: jnp.zeros((n,), jnp.float32)
    return dict(
        in_proj_weight=_xavier_uniform(ks[0], (3 * E, E)),
        in_proj_bias=zeros(3 * E),
        out_proj_weight=_xavier_uniform(ks[1], (E, E)),
        out_proj_bias=zeros(E),
        linear1_weight=_xavier_uniform(ks[2], (FF, E)),
        linear1_bias=zeros(FF),
        linear2_weight=_xavier_uniform(ks[3], (E, FF)),
        linear2_bias=zeros(E),
        norm1_weight=jnp.ones((E,), jnp.float32), norm1_bias=zeros(E),
        norm2_weight=jnp.ones((E,), jnp.float32), norm2_bias=zeros(E),
    )


def _reference_forward(src, params, num_heads, eps=1e-5):
    """Pure-JAX f32 reference (matches the PyTorch module in eval mode)."""
    S, B, E = src.shape
    H = num_heads
    Dh = E // H
    x = jnp.transpose(src, (1, 0, 2)).astype(jnp.float32)     # (B, S, E)
    wq, wk, wv = jnp.split(params["in_proj_weight"], 3, axis=0)
    bq, bk, bv = jnp.split(params["in_proj_bias"], 3)
    q = (x @ wq.T + bq) / math.sqrt(Dh)
    k = x @ wk.T + bk
    v = x @ wv.T + bv
    split = lambda t: t.reshape(B, S, H, Dh).transpose(0, 2, 1, 3)
    qh, kh, vh = split(q), split(k), split(v)
    s = jnp.einsum('bhqd,bhkd->bhqk', qh, kh)
    p = jax.nn.softmax(s, axis=-1)
    attn = jnp.mean(p, axis=1)                                # head-averaged
    ctx = jnp.einsum('bhqk,bhkd->bhqd', p, vh)
    ctx = ctx.transpose(0, 2, 1, 3).reshape(B, S, E)
    attn_out = ctx @ params["out_proj_weight"].T + params["out_proj_bias"]

    def ln(t, g, b):
        mu = t.mean(-1, keepdims=True)
        var = ((t - mu) ** 2).mean(-1, keepdims=True)
        return (t - mu) * jax.lax.rsqrt(var + eps) * g + b

    y = ln(x + attn_out, params["norm1_weight"], params["norm1_bias"])
    h1 = jnp.maximum(y @ params["linear1_weight"].T + params["linear1_bias"], 0.0)
    h2 = h1 @ params["linear2_weight"].T + params["linear2_bias"]
    z = ln(y + h2, params["norm2_weight"], params["norm2_bias"])
    return jnp.transpose(z, (1, 0, 2)), attn


if __name__ == "__main__":
    # Small shapes: seq=8, batch=2, d_model=32, nhead=4, dim_feedforward=64.
    # (num_channels / num_events are metadata for the unimplemented attention
    #  bias path and do not affect this no-bias variant.)
    S, B, E, H, FF = 8, 2, 32, 4, 64
    key = jax.random.PRNGKey(0)
    k_param, k_src = jax.random.split(key)
    params = make_params(k_param, E, FF)
    src = jax.random.normal(k_src, (S, B, E), jnp.float32)

    out, attn = transformer_encoder_layer(src, params, num_heads=H)
    jax.block_until_ready((out, attn))

    assert out.shape == (S, B, E) and attn.shape == (B, S, S)
    assert bool(jnp.all(jnp.isfinite(out))) and bool(jnp.all(jnp.isfinite(attn)))

    # Pure-JAX reference check (bf16 matmul operands inside the kernel -> loose tol).
    out_ref, attn_ref = _reference_forward(src, params, num_heads=H)
    out_err = float(jnp.max(jnp.abs(out - out_ref)))
    attn_err = float(jnp.max(jnp.abs(attn - attn_ref)))
    assert out_err < 1e-1, f"output mismatch: max abs err {out_err}"
    assert attn_err < 3e-2, f"attention-weight mismatch: max abs err {attn_err}"

    print("KERNEL_OK")
</pallas_src>

<mosaic_0001>
module attributes {stable_mosaic.version = 11 : i64} {
  func.func @_encoder_layer_kernel(%arg0: i32, %arg1: i32, %arg2: memref<1x8x32xf32, #tpu.memory_space<vmem>>, %arg3: memref<32x32xbf16, #tpu.memory_space<vmem>>, %arg4: memref<1x32xf32, #tpu.memory_space<vmem>>, %arg5: memref<32x64xbf16, #tpu.memory_space<vmem>>, %arg6: memref<1x64xf32, #tpu.memory_space<vmem>>, %arg7: memref<32x32xbf16, #tpu.memory_space<vmem>>, %arg8: memref<1x32xf32, #tpu.memory_space<vmem>>, %arg9: memref<32x64xbf16, #tpu.memory_space<vmem>>, %arg10: memref<1x64xf32, #tpu.memory_space<vmem>>, %arg11: memref<64x32xbf16, #tpu.memory_space<vmem>>, %arg12: memref<1x32xf32, #tpu.memory_space<vmem>>, %arg13: memref<1x32xf32, #tpu.memory_space<vmem>>, %arg14: memref<1x32xf32, #tpu.memory_space<vmem>>, %arg15: memref<1x32xf32, #tpu.memory_space<vmem>>, %arg16: memref<1x32xf32, #tpu.memory_space<vmem>>, %arg17: memref<1x8x32xf32, #tpu.memory_space<vmem>>, %arg18: memref<1x8x8xf32, #tpu.memory_space<vmem>>, %arg19: memref<8x64xbf16, #tpu.memory_space<vmem>>, %arg20: memref<8x32xf32, #tpu.memory_space<vmem>>) attributes {dimension_semantics = [#tpu.dimension_semantics<parallel>, #tpu.dimension_semantics<arbitrary>], iteration_bounds = array<i64: 2, 1>, scalar_prefetch = 0 : i64, scratch_operands = 2 : i64, tpu.core_type = #tpu.core_type<tc>, window_params = [{transform_indices = @transform_0, window_bounds = array<i64: 1, 8, 32>}, {pipeline_mode = #tpu.pipeline_mode<synchronous>, transform_indices = @transform_1, window_bounds = array<i64: 32, 32>}, {pipeline_mode = #tpu.pipeline_mode<synchronous>, transform_indices = @transform_2, window_bounds = array<i64: 1, 32>}, {pipeline_mode = #tpu.pipeline_mode<synchronous>, transform_indices = @transform_3, window_bounds = array<i64: 32, 64>}, {pipeline_mode = #tpu.pipeline_mode<synchronous>, transform_indices = @transform_4, window_bounds = array<i64: 1, 64>}, {pipeline_mode = #tpu.pipeline_mode<synchronous>, transform_indices = @transform_5, window_bounds = array<i64: 32, 32>}, {pipeline_mode = #tpu.pipeline_mode<synchronous>, transform_indices = @transform_6, window_bounds = array<i64: 1, 32>}, {pipeline_mode = #tpu.pipeline_mode<synchronous>, transform_indices = @transform_7, window_bounds = array<i64: 32, 64>}, {pipeline_mode = #tpu.pipeline_mode<synchronous>, transform_indices = @transform_8, window_bounds = array<i64: 1, 64>}, {pipeline_mode = #tpu.pipeline_mode<synchronous>, transform_indices = @transform_9, window_bounds = array<i64: 64, 32>}, {pipeline_mode = #tpu.pipeline_mode<synchronous>, transform_indices = @transform_10, window_bounds = array<i64: 1, 32>}, {pipeline_mode = #tpu.pipeline_mode<synchronous>, transform_indices = @transform_11, window_bounds = array<i64: 1, 32>}, {pipeline_mode = #tpu.pipeline_mode<synchronous>, transform_indices = @transform_12, window_bounds = array<i64: 1, 32>}, {pipeline_mode = #tpu.pipeline_mode<synchronous>, transform_indices = @transform_13, window_bounds = array<i64: 1, 32>}, {pipeline_mode = #tpu.pipeline_mode<synchronous>, transform_indices = @transform_14, window_bounds = array<i64: 1, 32>}, {transform_indices = @transform_15, window_bounds = array<i64: 1, 8, 32>}, {transform_indices = @transform_16, window_bounds = array<i64: 1, 8, 8>}]} {
    %c0_i32 = arith.constant 0 : i32
    %0 = arith.cmpi eq, %arg1, %c0_i32 : i32
    %1 = arith.extui %0 : i1 to i32
    %c0_i32_0 = arith.constant 0 : i32
    %2 = arith.cmpi ne, %1, %c0_i32_0 : i32
    scf.if %2 {
      %c0_83 = arith.constant 0 : index
      %c0_84 = arith.constant 0 : index
      %c0_85 = arith.constant 0 : index
      %163 = vector.load %arg2[%c0_83, %c0_84, %c0_85] : memref<1x8x32xf32, #tpu.memory_space<vmem>>, vector<1x8x32xf32>
      %164 = vector.shape_cast %163 : vector<1x8x32xf32> to vector<8x32xf32>
      %165 = arith.truncf %164 : vector<8x32xf32> to vector<8x32xbf16>
      %c0_86 = arith.constant 0 : index
      %c0_87 = arith.constant 0 : index
      %166 = vector.load %arg5[%c0_86, %c0_87] : memref<32x64xbf16, #tpu.memory_space<vmem>>, vector<32x64xbf16>
      %cst_88 = arith.constant dense<0.000000e+00> : vector<8x64xf32>
      %167 = tpu.matmul %165, %166, %cst_88 {dimension_numbers = #tpu.dot_dimension_numbers<[1], [0], [0], [1], [0, 0, 1, 1], [], []>} : vector<8x32xbf16>, vector<32x64xbf16>, vector<8x64xf32> -> vector<8x64xf32>
      %c0_89 = arith.constant 0 : index
      %c0_90 = arith.constant 0 : index
      %168 = vector.load %arg6[%c0_89, %c0_90] : memref<1x64xf32, #tpu.memory_space<vmem>>, vector<1x64xf32>
      %169 = vector.broadcast %168 : vector<1x64xf32> to vector<8x64xf32>
      %170 = arith.addf %167, %169 : vector<8x64xf32>
      %171 = arith.truncf %170 : vector<8x64xf32> to vector<8x64xbf16>
      %c0_91 = arith.constant 0 : index
      %c0_92 = arith.constant 0 : index
      %172 = vector.load %arg19[%c0_91, %c0_92] : memref<8x64xbf16, #tpu.memory_space<vmem>>, vector<8x64xbf16>
      tpu.vector_store %arg19[%c0_91, %c0_92], %171 {strides = array<i32>} : memref<8x64xbf16, #tpu.memory_space<vmem>>, vector<8x64xbf16>,
    } else {
    }
    %c8_i32 = arith.constant 8 : i32
    %3 = arith.muli %arg1, %c8_i32 : i32
    %4 = tpu.assume_multiple %3, 8 : i32
    %c0 = arith.constant 0 : index
    %5 = arith.index_cast %4 : i32 to index
    %c0_1 = arith.constant 0 : index
    %6 = vector.load %arg2[%c0, %5, %c0_1] : memref<1x8x32xf32, #tpu.memory_space<vmem>>, vector<1x8x32xf32>
    %7 = vector.shape_cast %6 : vector<1x8x32xf32> to vector<8x32xf32>
    %8 = arith.truncf %7 : vector<8x32xf32> to vector<8x32xbf16>
    %c0_2 = arith.constant 0 : index
    %c0_3 = arith.constant 0 : index
    %9 = vector.load %arg3[%c0_2, %c0_3] : memref<32x32xbf16, #tpu.memory_space<vmem>>, vector<32x32xbf16>
    %cst = arith.constant dense<0.000000e+00> : vector<8x32xf32>
    %10 = tpu.matmul %8, %9, %cst {dimension_numbers = #tpu.dot_dimension_numbers<[1], [0], [0], [1], [0, 0, 1, 1], [], []>} : vector<8x32xbf16>, vector<32x32xbf16>, vector<8x32xf32> -> vector<8x32xf32>
    %c0_4 = arith.constant 0 : index
    %c0_5 = arith.constant 0 : index
    %11 = vector.load %arg4[%c0_4, %c0_5] : memref<1x32xf32, #tpu.memory_space<vmem>>, vector<1x32xf32>
    %12 = vector.broadcast %11 : vector<1x32xf32> to vector<8x32xf32>
    %13 = arith.addf %10, %12 : vector<8x32xf32>
    %cst_6 = arith.constant 0.353553385 : f32
    %14 = vector.broadcast %cst_6 : f32 to vector<8x32xf32>
    %15 = arith.mulf %13, %14 : vector<8x32xf32>
    %16 = arith.truncf %15 : vector<8x32xf32> to vector<8x32xbf16>
    %17 = vector.extract_strided_slice %16 {offsets = [0, 0], sizes = [8, 8], strides = [1, 1]} : vector<8x32xbf16> to vector<8x8xbf16>
    %c0_7 = arith.constant 0 : index
    %c0_8 = arith.constant 0 : index
    %18 = vector.load %arg19[%c0_7, %c0_8] : memref<8x64xbf16, #tpu.memory_space<vmem>>, vector<8x8xbf16>
    %c0_9 = arith.constant 0 : index
    %c32 = arith.constant 32 : index
    %19 = vector.load %arg19[%c0_9, %c32] : memref<8x64xbf16, #tpu.memory_space<vmem>>, vector<8x8xbf16>
    "tpu.trace_start"() <{level = 10 : i32, message = "qd,kd->qk"}> : () -> ()
    %cst_10 = arith.constant dense<0.000000e+00> : vector<8x8xf32>
    %20 = tpu.matmul %17, %18, %cst_10 {dimension_numbers = #tpu.dot_dimension_numbers<[1], [1], [0], [0], [0, 0, 1, 0], [], []>} : vector<8x8xbf16>, vector<8x8xbf16>, vector<8x8xf32> -> vector<8x8xf32>
    "tpu.trace_stop"() : () -> ()
    %cst_11 = arith.constant dense<0xFF800000> : vector<8xf32>
    %21 = vector.multi_reduction <maximumf>, %20, %cst_11 [1] : vector<8x8xf32> to vector<8xf32>
    %22 = vector.shape_cast %21 : vector<8xf32> to vector<8x1xf32>
    %23 = vector.broadcast %22 : vector<8x1xf32> to vector<8x8xf32>
    %24 = arith.subf %20, %23 : vector<8x8xf32>
    %25 = math.exp %24 : vector<8x8xf32>
    %cst_12 = arith.constant dense<0.000000e+00> : vector<8xf32>
    %26 = vector.multi_reduction <add>, %25, %cst_12 [1] : vector<8x8xf32> to vector<8xf32>
    %27 = vector.shape_cast %26 : vector<8xf32> to vector<8x1xf32>
    %28 = vector.broadcast %27 : vector<8x1xf32> to vector<8x8xf32>
    %29 = arith.divf %25, %28 : vector<8x8xf32>
    %30 = arith.truncf %29 : vector<8x8xf32> to vector<8x8xbf16>
    %cst_13 = arith.constant dense<0.000000e+00> : vector<8x8xf32>
    %31 = tpu.matmul %30, %19, %cst_13 {dimension_numbers = #tpu.dot_dimension_numbers<[1], [0], [0], [1], [0, 0, 1, 1], [], []>} : vector<8x8xbf16>, vector<8x8xbf16>, vector<8x8xf32> -> vector<8x8xf32>
    %c0_14 = arith.constant 0 : index
    %c0_15 = arith.constant 0 : index
    %32 = vector.load %arg20[%c0_14, %c0_15] : memref<8x32xf32, #tpu.memory_space<vmem>>, vector<8x8xf32>
    tpu.vector_store %arg20[%c0_14, %c0_15], %31 {strides = array<i32>} : memref<8x32xf32, #tpu.memory_space<vmem>>, vector<8x8xf32>,
    %33 = vector.extract_strided_slice %16 {offsets = [0, 8], sizes = [8, 8], strides = [1, 1]} : vector<8x32xbf16> to vector<8x8xbf16>
    %c0_16 = arith.constant 0 : index
    %c8 = arith.constant 8 : index
    %34 = vector.load %arg19[%c0_16, %c8] : memref<8x64xbf16, #tpu.memory_space<vmem>>, vector<8x8xbf16>
    %c0_17 = arith.constant 0 : index
    %c40 = arith.constant 40 : index
    %35 = vector.load %arg19[%c0_17, %c40] : memref<8x64xbf16, #tpu.memory_space<vmem>>, vector<8x8xbf16>
    "tpu.trace_start"() <{level = 10 : i32, message = "qd,kd->qk"}> : () -> ()
    %cst_18 = arith.constant dense<0.000000e+00> : vector<8x8xf32>
    %36 = tpu.matmul %33, %34, %cst_18 {dimension_numbers = #tpu.dot_dimension_numbers<[1], [1], [0], [0], [0, 0, 1, 0], [], []>} : vector<8x8xbf16>, vector<8x8xbf16>, vector<8x8xf32> -> vector<8x8xf32>
    "tpu.trace_stop"() : () -> ()
    %cst_19 = arith.constant dense<0xFF800000> : vector<8xf32>
    %37 = vector.multi_reduction <maximumf>, %36, %cst_19 [1] : vector<8x8xf32> to vector<8xf32>
    %38 = vector.shape_cast %37 : vector<8xf32> to vector<8x1xf32>
    %39 = vector.broadcast %38 : vector<8x1xf32> to vector<8x8xf32>
    %40 = arith.subf %36, %39 : vector<8x8xf32>
    %41 = math.exp %40 : vector<8x8xf32>
    %cst_20 = arith.constant dense<0.000000e+00> : vector<8xf32>
    %42 = vector.multi_reduction <add>, %41, %cst_20 [1] : vector<8x8xf32> to vector<8xf32>
    %43 = vector.shape_cast %42 : vector<8xf32> to vector<8x1xf32>
    %44 = vector.broadcast %43 : vector<8x1xf32> to vector<8x8xf32>
    %45 = arith.divf %41, %44 : vector<8x8xf32>
    %46 = arith.addf %29, %45 : vector<8x8xf32>
    %47 = arith.truncf %45 : vector<8x8xf32> to vector<8x8xbf16>
    %cst_21 = arith.constant dense<0.000000e+00> : vector<8x8xf32>
    %48 = tpu.matmul %47, %35, %cst_21 {dimension_numbers = #tpu.dot_dimension_numbers<[1], [0], [0], [1], [0, 0, 1, 1], [], []>} : vector<8x8xbf16>, vector<8x8xbf16>, vector<8x8xf32> -> vector<8x8xf32>
    %c0_22 = arith.constant 0 : index
    %c8_23 = arith.constant 8 : index
    %49 = vector.load %arg20[%c0_22, %c8_23] : memref<8x32xf32, #tpu.memory_space<vmem>>, vector<8x8xf32>
    tpu.vector_store %arg20[%c0_22, %c8_23], %48 {strides = array<i32>} : memref<8x32xf32, #tpu.memory_space<vmem>>, vector<8x8xf32>,
    %50 = vector.extract_strided_slice %16 {offsets = [0, 16], sizes = [8, 8], strides = [1, 1]} : vector<8x32xbf16> to vector<8x8xbf16>
    %c0_24 = arith.constant 0 : index
    %c16 = arith.constant 16 : index
    %51 = vector.load %arg19[%c0_24, %c16] : memref<8x64xbf16, #tpu.memory_space<vmem>>, vector<8x8xbf16>
    %c0_25 = arith.constant 0 : index
    %c48 = arith.constant 48 : index
    %52 = vector.load %arg19[%c0_25, %c48] : memref<8x64xbf16, #tpu.memory_space<vmem>>, vector<8x8xbf16>
    "tpu.trace_start"() <{level = 10 : i32, message = "qd,kd->qk"}> : () -> ()
    %cst_26 = arith.constant dense<0.000000e+00> : vector<8x8xf32>
    %53 = tpu.matmul %50, %51, %cst_26 {dimension_numbers = #tpu.dot_dimension_numbers<[1], [1], [0], [0], [0, 0, 1, 0], [], []>} : vector<8x8xbf16>, vector<8x8xbf16>, vector<8x8xf32> -> vector<8x8xf32>
    "tpu.trace_stop"() : () -> ()
    %cst_27 = arith.constant dense<0xFF800000> : vector<8xf32>
    %54 = vector.multi_reduction <maximumf>, %53, %cst_27 [1] : vector<8x8xf32> to vector<8xf32>
    %55 = vector.shape_cast %54 : vector<8xf32> to vector<8x1xf32>
    %56 = vector.broadcast %55 : vector<8x1xf32> to vector<8x8xf32>
    %57 = arith.subf %53, %56 : vector<8x8xf32>
    %58 = math.exp %57 : vector<8x8xf32>
    %cst_28 = arith.constant dense<0.000000e+00> : vector<8xf32>
    %59 = vector.multi_reduction <add>, %58, %cst_28 [1] : vector<8x8xf32> to vector<8xf32>
    %60 = vector.shape_cast %59 : vector<8xf32> to vector<8x1xf32>
    %61 = vector.broadcast %60 : vector<8x1xf32> to vector<8x8xf32>
    %62 = arith.divf %58, %61 : vector<8x8xf32>
    %63 = arith.addf %46, %62 : vector<8x8xf32>
    %64 = arith.truncf %62 : vector<8x8xf32> to vector<8x8xbf16>
    %cst_29 = arith.constant dense<0.000000e+00> : vector<8x8xf32>
    %65 = tpu.matmul %64, %52, %cst_29 {dimension_numbers = #tpu.dot_dimension_numbers<[1], [0], [0], [1], [0, 0, 1, 1], [], []>} : vector<8x8xbf16>, vector<8x8xbf16>, vector<8x8xf32> -> vector<8x8xf32>
    %c0_30 = arith.constant 0 : index
    %c16_31 = arith.constant 16 : index
    %66 = vector.load %arg20[%c0_30, %c16_31] : memref<8x32xf32, #tpu.memory_space<vmem>>, vector<8x8xf32>
    tpu.vector_store %arg20[%c0_30, %c16_31], %65 {strides = array<i32>} : memref<8x32xf32, #tpu.memory_space<vmem>>, vector<8x8xf32>,
    %67 = vector.extract_strided_slice %16 {offsets = [0, 24], sizes = [8, 8], strides = [1, 1]} : vector<8x32xbf16> to vector<8x8xbf16>
    %c0_32 = arith.constant 0 : index
    %c24 = arith.constant 24 : index
    %68 = vector.load %arg19[%c0_32, %c24] : memref<8x64xbf16, #tpu.memory_space<vmem>>, vector<8x8xbf16>
    %c0_33 = arith.constant 0 : index
    %c56 = arith.constant 56 : index
    %69 = vector.load %arg19[%c0_33, %c56] : memref<8x64xbf16, #tpu.memory_space<vmem>>, vector<8x8xbf16>
    "tpu.trace_start"() <{level = 10 : i32, message = "qd,kd->qk"}> : () -> ()
    %cst_34 = arith.constant dense<0.000000e+00> : vector<8x8xf32>
    %70 = tpu.matmul %67, %68, %cst_34 {dimension_numbers = #tpu.dot_dimension_numbers<[1], [1], [0], [0], [0, 0, 1, 0], [], []>} : vector<8x8xbf16>, vector<8x8xbf16>, vector<8x8xf32> -> vector<8x8xf32>
    "tpu.trace_stop"() : () -> ()
    %cst_35 = arith.constant dense<0xFF800000> : vector<8xf32>
    %71 = vector.multi_reduction <maximumf>, %70, %cst_35 [1] : vector<8x8xf32> to vector<8xf32>
    %72 = vector.shape_cast %71 : vector<8xf32> to vector<8x1xf32>
    %73 = vector.broadcast %72 : vector<8x1xf32> to vector<8x8xf32>
    %74 = arith.subf %70, %73 : vector<8x8xf32>
    %75 = math.exp %74 : vector<8x8xf32>
    %cst_36 = arith.constant dense<0.000000e+00> : vector<8xf32>
    %76 = vector.multi_reduction <add>, %75, %cst_36 [1] : vector<8x8xf32> to vector<8xf32>
    %77 = vector.shape_cast %76 : vector<8xf32> to vector<8x1xf32>
    %78 = vector.broadcast %77 : vector<8x1xf32> to vector<8x8xf32>
    %79 = arith.divf %75, %78 : vector<8x8xf32>
    %80 = arith.addf %63, %79 : vector<8x8xf32>
    %81 = arith.truncf %79 : vector<8x8xf32> to vector<8x8xbf16>
    %cst_37 = arith.constant dense<0.000000e+00> : vector<8x8xf32>
    %82 = tpu.matmul %81, %69, %cst_37 {dimension_numbers = #tpu.dot_dimension_numbers<[1], [0], [0], [1], [0, 0, 1, 1], [], []>} : vector<8x8xbf16>, vector<8x8xbf16>, vector<8x8xf32> -> vector<8x8xf32>
    %c0_38 = arith.constant 0 : index
    %c24_39 = arith.constant 24 : index
    %83 = vector.load %arg20[%c0_38, %c24_39] : memref<8x32xf32, #tpu.memory_space<vmem>>, vector<8x8xf32>
    tpu.vector_store %arg20[%c0_38, %c24_39], %82 {strides = array<i32>} : memref<8x32xf32, #tpu.memory_space<vmem>>, vector<8x8xf32>,
    %cst_40 = arith.constant 2.500000e-01 : f32
    %84 = vector.broadcast %cst_40 : f32 to vector<8x8xf32>
    %85 = arith.mulf %80, %84 : vector<8x8xf32>
    %c0_41 = arith.constant 0 : index
    %c0_42 = arith.constant 0 : index
    %c0_43 = arith.constant 0 : index
    %86 = vector.load %arg18[%c0_41, %c0_42, %c0_43] : memref<1x8x8xf32, #tpu.memory_space<vmem>>, vector<1x8x8xf32>
    %87 = vector.shape_cast %86 : vector<1x8x8xf32> to vector<8x8xf32>
    %88 = vector.shape_cast %85 : vector<8x8xf32> to vector<1x8x8xf32>
    tpu.vector_store %arg18[%c0_41, %c0_42, %c0_43], %88 {strides = array<i32>} : memref<1x8x8xf32, #tpu.memory_space<vmem>>, vector<1x8x8xf32>,
    %c0_44 = arith.constant 0 : index
    %c0_45 = arith.constant 0 : index
    %89 = vector.load %arg20[%c0_44, %c0_45] : memref<8x32xf32, #tpu.memory_space<vmem>>, vector<8x32xf32>
    %90 = arith.truncf %89 : vector<8x32xf32> to vector<8x32xbf16>
    %c0_46 = arith.constant 0 : index
    %c0_47 = arith.constant 0 : index
    %91 = vector.load %arg7[%c0_46, %c0_47] : memref<32x32xbf16, #tpu.memory_space<vmem>>, vector<32x32xbf16>
    %cst_48 = arith.constant dense<0.000000e+00> : vector<8x32xf32>
    %92 = tpu.matmul %90, %91, %cst_48 {dimension_numbers = #tpu.dot_dimension_numbers<[1], [0], [0], [1], [0, 0, 1, 1], [], []>} : vector<8x32xbf16>, vector<32x32xbf16>, vector<8x32xf32> -> vector<8x32xf32>
    %c0_49 = arith.constant 0 : index
    %c0_50 = arith.constant 0 : index
    %93 = vector.load %arg8[%c0_49, %c0_50] : memref<1x32xf32, #tpu.memory_space<vmem>>, vector<1x32xf32>
    %94 = vector.broadcast %93 : vector<1x32xf32> to vector<8x32xf32>
    %95 = arith.addf %92, %94 : vector<8x32xf32>
    %96 = arith.addf %7, %95 : vector<8x32xf32>
    %cst_51 = arith.constant dense<0.000000e+00> : vector<8xf32>
    %97 = vector.multi_reduction <add>, %96, %cst_51 [1] : vector<8x32xf32> to vector<8xf32>
    %98 = vector.shape_cast %97 : vector<8xf32> to vector<8x1xf32>
    %cst_52 = arith.constant 3.200000e+01 : f32
    %99 = vector.broadcast %cst_52 : f32 to vector<8x1xf32>
    %100 = arith.divf %98, %99 : vector<8x1xf32>
    %101 = vector.broadcast %100 : vector<8x1xf32> to vector<8x32xf32>
    %102 = arith.subf %96, %101 : vector<8x32xf32>
    %103 = arith.mulf %102, %102 : vector<8x32xf32>
    %cst_53 = arith.constant dense<0.000000e+00> : vector<8xf32>
    %104 = vector.multi_reduction <add>, %103, %cst_53 [1] : vector<8x32xf32> to vector<8xf32>
    %105 = vector.shape_cast %104 : vector<8xf32> to vector<8x1xf32>
    %cst_54 = arith.constant 3.200000e+01 : f32
    %106 = vector.broadcast %cst_54 : f32 to vector<8x1xf32>
    %107 = arith.divf %105, %106 : vector<8x1xf32>
    %108 = vector.broadcast %100 : vector<8x1xf32> to vector<8x32xf32>
    %109 = arith.subf %96, %108 : vector<8x32xf32>
    %cst_55 = arith.constant 9.99999974E-6 : f32
    %110 = vector.broadcast %cst_55 : f32 to vector<8x1xf32>
    %111 = arith.addf %107, %110 : vector<8x1xf32>
    %112 = math.rsqrt %111 : vector<8x1xf32>
    %113 = vector.broadcast %112 : vector<8x1xf32> to vector<8x32xf32>
    %114 = arith.mulf %109, %113 : vector<8x32xf32>
    %c0_56 = arith.constant 0 : index
    %c0_57 = arith.constant 0 : index
    %115 = vector.load %arg13[%c0_56, %c0_57] : memref<1x32xf32, #tpu.memory_space<vmem>>, vector<1x32xf32>
    %116 = vector.broadcast %115 : vector<1x32xf32> to vector<8x32xf32>
    %117 = arith.mulf %114, %116 : vector<8x32xf32>
    %c0_58 = arith.constant 0 : index
    %c0_59 = arith.constant 0 : index
    %118 = vector.load %arg14[%c0_58, %c0_59] : memref<1x32xf32, #tpu.memory_space<vmem>>, vector<1x32xf32>
    %119 = vector.broadcast %118 : vector<1x32xf32> to vector<8x32xf32>
    %120 = arith.addf %117, %119 : vector<8x32xf32>
    %121 = arith.truncf %120 : vector<8x32xf32> to vector<8x32xbf16>
    %c0_60 = arith.constant 0 : index
    %c0_61 = arith.constant 0 : index
    %122 = vector.load %arg9[%c0_60, %c0_61] : memref<32x64xbf16, #tpu.memory_space<vmem>>, vector<32x64xbf16>
    %cst_62 = arith.constant dense<0.000000e+00> : vector<8x64xf32>
    %123 = tpu.matmul %121, %122, %cst_62 {dimension_numbers = #tpu.dot_dimension_numbers<[1], [0], [0], [1], [0, 0, 1, 1], [], []>} : vector<8x32xbf16>, vector<32x64xbf16>, vector<8x64xf32> -> vector<8x64xf32>
    %c0_63 = arith.constant 0 : index
    %c0_64 = arith.constant 0 : index
    %124 = vector.load %arg10[%c0_63, %c0_64] : memref<1x64xf32, #tpu.memory_space<vmem>>, vector<1x64xf32>
    %125 = vector.broadcast %124 : vector<1x64xf32> to vector<8x64xf32>
    %126 = arith.addf %123, %125 : vector<8x64xf32>
    %cst_65 = arith.constant 0.000000e+00 : f32
    %127 = vector.broadcast %cst_65 : f32 to vector<8x64xf32>
    %128 = arith.maximumf %126, %127 : vector<8x64xf32>
    %129 = arith.truncf %128 : vector<8x64xf32> to vector<8x64xbf16>
    %c0_66 = arith.constant 0 : index
    %c0_67 = arith.constant 0 : index
    %130 = vector.load %arg11[%c0_66, %c0_67] : memref<64x32xbf16, #tpu.memory_space<vmem>>, vector<64x32xbf16>
    %cst_68 = arith.constant dense<0.000000e+00> : vector<8x32xf32>
    %131 = tpu.matmul %129, %130, %cst_68 {dimension_numbers = #tpu.dot_dimension_numbers<[1], [0], [0], [1], [0, 0, 1, 1], [], []>} : vector<8x64xbf16>, vector<64x32xbf16>, vector<8x32xf32> -> vector<8x32xf32>
    %c0_69 = arith.constant 0 : index
    %c0_70 = arith.constant 0 : index
    %132 = vector.load %arg12[%c0_69, %c0_70] : memref<1x32xf32, #tpu.memory_space<vmem>>, vector<1x32xf32>
    %133 = vector.broadcast %132 : vector<1x32xf32> to vector<8x32xf32>
    %134 = arith.addf %131, %133 : vector<8x32xf32>
    %135 = arith.addf %120, %134 : vector<8x32xf32>
    %cst_71 = arith.constant dense<0.000000e+00> : vector<8xf32>
    %136 = vector.multi_reduction <add>, %135, %cst_71 [1] : vector<8x32xf32> to vector<8xf32>
    %137 = vector.shape_cast %136 : vector<8xf32> to vector<8x1xf32>
    %cst_72 = arith.constant 3.200000e+01 : f32
    %138 = vector.broadcast %cst_72 : f32 to vector<8x1xf32>
    %139 = arith.divf %137, %138 : vector<8x1xf32>
    %140 = vector.broadcast %139 : vector<8x1xf32> to vector<8x32xf32>
    %141 = arith.subf %135, %140 : vector<8x32xf32>
    %142 = arith.mulf %141, %141 : vector<8x32xf32>
    %cst_73 = arith.constant dense<0.000000e+00> : vector<8xf32>
    %143 = vector.multi_reduction <add>, %142, %cst_73 [1] : vector<8x32xf32> to vector<8xf32>
    %144 = vector.shape_cast %143 : vector<8xf32> to vector<8x1xf32>
    %cst_74 = arith.constant 3.200000e+01 : f32
    %145 = vector.broadcast %cst_74 : f32 to vector<8x1xf32>
    %146 = arith.divf %144, %145 : vector<8x1xf32>
    %147 = vector.broadcast %139 : vector<8x1xf32> to vector<8x32xf32>
    %148 = arith.subf %135, %147 : vector<8x32xf32>
    %cst_75 = arith.constant 9.99999974E-6 : f32
    %149 = vector.broadcast %cst_75 : f32 to vector<8x1xf32>
    %150 = arith.addf %146, %149 : vector<8x1xf32>
    %151 = math.rsqrt %150 : vector<8x1xf32>
    %152 = vector.broadcast %151 : vector<8x1xf32> to vector<8x32xf32>
    %153 = arith.mulf %148, %152 : vector<8x32xf32>
    %c0_76 = arith.constant 0 : index
    %c0_77 = arith.constant 0 : index
    %154 = vector.load %arg15[%c0_76, %c0_77] : memref<1x32xf32, #tpu.memory_space<vmem>>, vector<1x32xf32>
    %155 = vector.broadcast %154 : vector<1x32xf32> to vector<8x32xf32>
    %156 = arith.mulf %153, %155 : vector<8x32xf32>
    %c0_78 = arith.constant 0 : index
    %c0_79 = arith.constant 0 : index
    %157 = vector.load %arg16[%c0_78, %c0_79] : memref<1x32xf32, #tpu.memory_space<vmem>>, vector<1x32xf32>
    %158 = vector.broadcast %157 : vector<1x32xf32> to vector<8x32xf32>
    %159 = arith.addf %156, %158 : vector<8x32xf32>
    %c0_80 = arith.constant 0 : index
    %c0_81 = arith.constant 0 : index
    %c0_82 = arith.constant 0 : index
    %160 = vector.load %arg17[%c0_80, %c0_81, %c0_82] : memref<1x8x32xf32, #tpu.memory_space<vmem>>, vector<1x8x32xf32>
    %161 = vector.shape_cast %160 : vector<1x8x32xf32> to vector<8x32xf32>
    %162 = vector.shape_cast %159 : vector<8x32xf32> to vector<1x8x32xf32>
    tpu.vector_store %arg17[%c0_80, %c0_81, %c0_82], %162 {strides = array<i32>} : memref<1x8x32xf32, #tpu.memory_space<vmem>>, vector<1x8x32xf32>,
    return
  }
  func.func @transform_0(%arg0: i32, %arg1: i32) -> (i32, i32, i32) {
    %c0_i32 = arith.constant 0 : i32
    %c0_i32_0 = arith.constant 0 : i32
    %c0_i32_1 = arith.constant 0 : i32
    return %arg0, %c0_i32, %c0_i32_0 : i32, i32, i32
  }
  func.func @transform_1(%arg0: i32, %arg1: i32) -> (i32, i32) {
    %c0_i32 = arith.constant 0 : i32
    %c0_i32_0 = arith.constant 0 : i32
    %c0_i32_1 = arith.constant 0 : i32
    return %c0_i32, %c0_i32_0 : i32, i32
  }
  func.func @transform_2(%arg0: i32, %arg1: i32) -> (i32, i32) {
    %c0_i32 = arith.constant 0 : i32
    %c0_i32_0 = arith.constant 0 : i32
    %c0_i32_1 = arith.constant 0 : i32
    return %c0_i32, %c0_i32_0 : i32, i32
  }
  func.func @transform_3(%arg0: i32, %arg1: i32) -> (i32, i32) {
    %c0_i32 = arith.constant 0 : i32
    %c0_i32_0 = arith.constant 0 : i32
    %c0_i32_1 = arith.constant 0 : i32
    return %c0_i32, %c0_i32_0 : i32, i32
  }
  func.func @transform_4(%arg0: i32, %arg1: i32) -> (i32, i32) {
    %c0_i32 = arith.constant 0 : i32
    %c0_i32_0 = arith.constant 0 : i32
    %c0_i32_1 = arith.constant 0 : i32
    return %c0_i32, %c0_i32_0 : i32, i32
  }
  func.func @transform_5(%arg0: i32, %arg1: i32) -> (i32, i32) {
    %c0_i32 = arith.constant 0 : i32
    %c0_i32_0 = arith.constant 0 : i32
    %c0_i32_1 = arith.constant 0 : i32
    return %c0_i32, %c0_i32_0 : i32, i32
  }
  func.func @transform_6(%arg0: i32, %arg1: i32) -> (i32, i32) {
    %c0_i32 = arith.constant 0 : i32
    %c0_i32_0 = arith.constant 0 : i32
    %c0_i32_1 = arith.constant 0 : i32
    return %c0_i32, %c0_i32_0 : i32, i32
  }
  func.func @transform_7(%arg0: i32, %arg1: i32) -> (i32, i32) {
    %c0_i32 = arith.constant 0 : i32
    %c0_i32_0 = arith.constant 0 : i32
    %c0_i32_1 = arith.constant 0 : i32
    return %c0_i32, %c0_i32_0 : i32, i32
  }
  func.func @transform_8(%arg0: i32, %arg1: i32) -> (i32, i32) {
    %c0_i32 = arith.constant 0 : i32
    %c0_i32_0 = arith.constant 0 : i32
    %c0_i32_1 = arith.constant 0 : i32
    return %c0_i32, %c0_i32_0 : i32, i32
  }
  func.func @transform_9(%arg0: i32, %arg1: i32) -> (i32, i32) {
    %c0_i32 = arith.constant 0 : i32
    %c0_i32_0 = arith.constant 0 : i32
    %c0_i32_1 = arith.constant 0 : i32
    return %c0_i32, %c0_i32_0 : i32, i32
  }
  func.func @transform_10(%arg0: i32, %arg1: i32) -> (i32, i32) {
    %c0_i32 = arith.constant 0 : i32
    %c0_i32_0 = arith.constant 0 : i32
    %c0_i32_1 = arith.constant 0 : i32
    return %c0_i32, %c0_i32_0 : i32, i32
  }
  func.func @transform_11(%arg0: i32, %arg1: i32) -> (i32, i32) {
    %c0_i32 = arith.constant 0 : i32
    %c0_i32_0 = arith.constant 0 : i32
    %c0_i32_1 = arith.constant 0 : i32
    return %c0_i32, %c0_i32_0 : i32, i32
  }
  func.func @transform_12(%arg0: i32, %arg1: i32) -> (i32, i32) {
    %c0_i32 = arith.constant 0 : i32
    %c0_i32_0 = arith.constant 0 : i32
    %c0_i32_1 = arith.constant 0 : i32
    return %c0_i32, %c0_i32_0 : i32, i32
  }
  func.func @transform_13(%arg0: i32, %arg1: i32) -> (i32, i32) {
    %c0_i32 = arith.constant 0 : i32
    %c0_i32_0 = arith.constant 0 : i32
    %c0_i32_1 = arith.constant 0 : i32
    return %c0_i32, %c0_i32_0 : i32, i32
  }
  func.func @transform_14(%arg0: i32, %arg1: i32) -> (i32, i32) {
    %c0_i32 = arith.constant 0 : i32
    %c0_i32_0 = arith.constant 0 : i32
    %c0_i32_1 = arith.constant 0 : i32
    return %c0_i32, %c0_i32_0 : i32, i32
  }
  func.func @transform_15(%arg0: i32, %arg1: i32) -> (i32, i32, i32) {
    %c0_i32 = arith.constant 0 : i32
    %c0_i32_0 = arith.constant 0 : i32
    return %arg0, %arg1, %c0_i32 : i32, i32, i32
  }
  func.func @transform_16(%arg0: i32, %arg1: i32) -> (i32, i32, i32) {
    %c0_i32 = arith.constant 0 : i32
    %c0_i32_0 = arith.constant 0 : i32
    return %arg0, %arg1, %c0_i32 : i32, i32, i32
  }
}

module attributes {stable_mosaic.version = 11 : i64} {
  func.func @_encoder_layer_kernel(%arg0: i32, %arg1: i32, %arg2: memref<1x8x32xf32, #tpu.memory_space<vmem>>, %arg3: memref<32x32xbf16, #tpu.memory_space<vmem>>, %arg4: memref<1x32xf32, #tpu.memory_space<vmem>>, %arg5: memref<32x64xbf16, #tpu.memory_space<vmem>>, %arg6: memref<1x64xf32, #tpu.memory_space<vmem>>, %arg7: memref<32x32xbf16, #tpu.memory_space<vmem>>, %arg8: memref<1x32xf32, #tpu.memory_space<vmem>>, %arg9: memref<32x64xbf16, #tpu.memory_space<vmem>>, %arg10: memref<1x64xf32, #tpu.memory_space<vmem>>, %arg11: memref<64x32xbf16, #tpu.memory_space<vmem>>, %arg12: memref<1x32xf32, #tpu.memory_space<vmem>>, %arg13: memref<1x32xf32, #tpu.memory_space<vmem>>, %arg14: memref<1x32xf32, #tpu.memory_space<vmem>>, %arg15: memref<1x32xf32, #tpu.memory_space<vmem>>, %arg16: memref<1x32xf32, #tpu.memory_space<vmem>>, %arg17: memref<1x8x32xf32, #tpu.memory_space<vmem>>, %arg18: memref<1x8x8xf32, #tpu.memory_space<vmem>>, %arg19: memref<8x64xbf16, #tpu.memory_space<vmem>>, %arg20: memref<8x32xf32, #tpu.memory_space<vmem>>) attributes {dimension_semantics = [#tpu.dimension_semantics<parallel>, #tpu.dimension_semantics<arbitrary>], iteration_bounds = array<i64: 2, 1>, scalar_prefetch = 0 : i64, scratch_operands = 2 : i64, tpu.core_type = #tpu.core_type<tc>, window_params = [{transform_indices = @transform_0, window_bounds = array<i64: 1, 8, 32>}, {pipeline_mode = #tpu.pipeline_mode<synchronous>, transform_indices = @transform_1, window_bounds = array<i64: 32, 32>}, {pipeline_mode = #tpu.pipeline_mode<synchronous>, transform_indices = @transform_2, window_bounds = array<i64: 1, 32>}, {pipeline_mode = #tpu.pipeline_mode<synchronous>, transform_indices = @transform_3, window_bounds = array<i64: 32, 64>}, {pipeline_mode = #tpu.pipeline_mode<synchronous>, transform_indices = @transform_4, window_bounds = array<i64: 1, 64>}, {pipeline_mode = #tpu.pipeline_mode<synchronous>, transform_indices = @transform_5, window_bounds = array<i64: 32, 32>}, {pipeline_mode = #tpu.pipeline_mode<synchronous>, transform_indices = @transform_6, window_bounds = array<i64: 1, 32>}, {pipeline_mode = #tpu.pipeline_mode<synchronous>, transform_indices = @transform_7, window_bounds = array<i64: 32, 64>}, {pipeline_mode = #tpu.pipeline_mode<synchronous>, transform_indices = @transform_8, window_bounds = array<i64: 1, 64>}, {pipeline_mode = #tpu.pipeline_mode<synchronous>, transform_indices = @transform_9, window_bounds = array<i64: 64, 32>}, {pipeline_mode = #tpu.pipeline_mode<synchronous>, transform_indices = @transform_10, window_bounds = array<i64: 1, 32>}, {pipeline_mode = #tpu.pipeline_mode<synchronous>, transform_indices = @transform_11, window_bounds = array<i64: 1, 32>}, {pipeline_mode = #tpu.pipeline_mode<synchronous>, transform_indices = @transform_12, window_bounds = array<i64: 1, 32>}, {pipeline_mode = #tpu.pipeline_mode<synchronous>, transform_indices = @transform_13, window_bounds = array<i64: 1, 32>}, {pipeline_mode = #tpu.pipeline_mode<synchronous>, transform_indices = @transform_14, window_bounds = array<i64: 1, 32>}, {transform_indices = @transform_15, window_bounds = array<i64: 1, 8, 32>}, {transform_indices = @transform_16, window_bounds = array<i64: 1, 8, 8>}]} {
    %c0_i32 = arith.constant 0 : i32
    %0 = arith.cmpi eq, %arg1, %c0_i32 : i32
    %1 = arith.extui %0 : i1 to i32
    %c0_i32_0 = arith.constant 0 : i32
    %2 = arith.cmpi ne, %1, %c0_i32_0 : i32
    scf.if %2 {
      %c0_83 = arith.constant 0 : index
      %c0_84 = arith.constant 0 : index
      %c0_85 = arith.constant 0 : index
      %163 = vector.load %arg2[%c0_83, %c0_84, %c0_85] : memref<1x8x32xf32, #tpu.memory_space<vmem>>, vector<1x8x32xf32>
      %164 = vector.shape_cast %163 : vector<1x8x32xf32> to vector<8x32xf32>
      %165 = arith.truncf %164 : vector<8x32xf32> to vector<8x32xbf16>
      %c0_86 = arith.constant 0 : index
      %c0_87 = arith.constant 0 : index
      %166 = vector.load %arg5[%c0_86, %c0_87] : memref<32x64xbf16, #tpu.memory_space<vmem>>, vector<32x64xbf16>
      %cst_88 = arith.constant dense<0.000000e+00> : vector<8x64xf32>
      %167 = tpu.matmul %165, %166, %cst_88 {dimension_numbers = #tpu.dot_dimension_numbers<[1], [0], [0], [1], [0, 0, 1, 1], [], []>} : vector<8x32xbf16>, vector<32x64xbf16>, vector<8x64xf32> -> vector<8x64xf32>
      %c0_89 = arith.constant 0 : index
      %c0_90 = arith.constant 0 : index
      %168 = vector.load %arg6[%c0_89, %c0_90] : memref<1x64xf32, #tpu.memory_space<vmem>>, vector<1x64xf32>
      %169 = vector.broadcast %168 : vector<1x64xf32> to vector<8x64xf32>
      %170 = arith.addf %167, %169 : vector<8x64xf32>
      %171 = arith.truncf %170 : vector<8x64xf32> to vector<8x64xbf16>
      %c0_91 = arith.constant 0 : index
      %c0_92 = arith.constant 0 : index
      %172 = vector.load %arg19[%c0_91, %c0_92] : memref<8x64xbf16, #tpu.memory_space<vmem>>, vector<8x64xbf16>
      tpu.vector_store %arg19[%c0_91, %c0_92], %171 {strides = array<i32>} : memref<8x64xbf16, #tpu.memory_space<vmem>>, vector<8x64xbf16>,
    } else {
    }
    %c8_i32 = arith.constant 8 : i32
    %3 = arith.muli %arg1, %c8_i32 : i32
    %4 = tpu.assume_multiple %3, 8 : i32
    %c0 = arith.constant 0 : index
    %5 = arith.index_cast %4 : i32 to index
    %c0_1 = arith.constant 0 : index
    %6 = vector.load %arg2[%c0, %5, %c0_1] : memref<1x8x32xf32, #tpu.memory_space<vmem>>, vector<1x8x32xf32>
    %7 = vector.shape_cast %6 : vector<1x8x32xf32> to vector<8x32xf32>
    %8 = arith.truncf %7 : vector<8x32xf32> to vector<8x32xbf16>
    %c0_2 = arith.constant 0 : index
    %c0_3 = arith.constant 0 : index
    %9 = vector.load %arg3[%c0_2, %c0_3] : memref<32x32xbf16, #tpu.memory_space<vmem>>, vector<32x32xbf16>
    %cst = arith.constant dense<0.000000e+00> : vector<8x32xf32>
    %10 = tpu.matmul %8, %9, %cst {dimension_numbers = #tpu.dot_dimension_numbers<[1], [0], [0], [1], [0, 0, 1, 1], [], []>} : vector<8x32xbf16>, vector<32x32xbf16>, vector<8x32xf32> -> vector<8x32xf32>
    %c0_4 = arith.constant 0 : index
    %c0_5 = arith.constant 0 : index
    %11 = vector.load %arg4[%c0_4, %c0_5] : memref<1x32xf32, #tpu.memory_space<vmem>>, vector<1x32xf32>
    %12 = vector.broadcast %11 : vector<1x32xf32> to vector<8x32xf32>
    %13 = arith.addf %10, %12 : vector<8x32xf32>
    %cst_6 = arith.constant 0.353553385 : f32
    %14 = vector.broadcast %cst_6 : f32 to vector<8x32xf32>
    %15 = arith.mulf %13, %14 : vector<8x32xf32>
    %16 = arith.truncf %15 : vector<8x32xf32> to vector<8x32xbf16>
    %17 = vector.extract_strided_slice %16 {offsets = [0, 0], sizes = [8, 8], strides = [1, 1]} : vector<8x32xbf16> to vector<8x8xbf16>
    %c0_7 = arith.constant 0 : index
    %c0_8 = arith.constant 0 : index
    %18 = vector.load %arg19[%c0_7, %c0_8] : memref<8x64xbf16, #tpu.memory_space<vmem>>, vector<8x8xbf16>
    %c0_9 = arith.constant 0 : index
    %c32 = arith.constant 32 : index
    %19 = vector.load %arg19[%c0_9, %c32] : memref<8x64xbf16, #tpu.memory_space<vmem>>, vector<8x8xbf16>
    "tpu.trace_start"() <{level = 10 : i32, message = "qd,kd->qk"}> : () -> ()
    %cst_10 = arith.constant dense<0.000000e+00> : vector<8x8xf32>
    %20 = tpu.matmul %17, %18, %cst_10 {dimension_numbers = #tpu.dot_dimension_numbers<[1], [1], [0], [0], [0, 0, 1, 0], [], []>} : vector<8x8xbf16>, vector<8x8xbf16>, vector<8x8xf32> -> vector<8x8xf32>
    "tpu.trace_stop"() : () -> ()
    %cst_11 = arith.constant dense<0xFF800000> : vector<8xf32>
    %21 = vector.multi_reduction <maximumf>, %20, %cst_11 [1] : vector<8x8xf32> to vector<8xf32>
    %22 = vector.shape_cast %21 : vector<8xf32> to vector<8x1xf32>
    %23 = vector.broadcast %22 : vector<8x1xf32> to vector<8x8xf32>
    %24 = arith.subf %20, %23 : vector<8x8xf32>
    %25 = math.exp %24 : vector<8x8xf32>
    %cst_12 = arith.constant dense<0.000000e+00> : vector<8xf32>
    %26 = vector.multi_reduction <add>, %25, %cst_12 [1] : vector<8x8xf32> to vector<8xf32>
    %27 = vector.shape_cast %26 : vector<8xf32> to vector<8x1xf32>
    %28 = vector.broadcast %27 : vector<8x1xf32> to vector<8x8xf32>
    %29 = arith.divf %25, %28 : vector<8x8xf32>
    %30 = arith.truncf %29 : vector<8x8xf32> to vector<8x8xbf16>
    %cst_13 = arith.constant dense<0.000000e+00> : vector<8x8xf32>
    %31 = tpu.matmul %30, %19, %cst_13 {dimension_numbers = #tpu.dot_dimension_numbers<[1], [0], [0], [1], [0, 0, 1, 1], [], []>} : vector<8x8xbf16>, vector<8x8xbf16>, vector<8x8xf32> -> vector<8x8xf32>
    %c0_14 = arith.constant 0 : index
    %c0_15 = arith.constant 0 : index
    %32 = vector.load %arg20[%c0_14, %c0_15] : memref<8x32xf32, #tpu.memory_space<vmem>>, vector<8x8xf32>
    tpu.vector_store %arg20[%c0_14, %c0_15], %31 {strides = array<i32>} : memref<8x32xf32, #tpu.memory_space<vmem>>, vector<8x8xf32>,
    %33 = vector.extract_strided_slice %16 {offsets = [0, 8], sizes = [8, 8], strides = [1, 1]} : vector<8x32xbf16> to vector<8x8xbf16>
    %c0_16 = arith.constant 0 : index
    %c8 = arith.constant 8 : index
    %34 = vector.load %arg19[%c0_16, %c8] : memref<8x64xbf16, #tpu.memory_space<vmem>>, vector<8x8xbf16>
    %c0_17 = arith.constant 0 : index
    %c40 = arith.constant 40 : index
    %35 = vector.load %arg19[%c0_17, %c40] : memref<8x64xbf16, #tpu.memory_space<vmem>>, vector<8x8xbf16>
    "tpu.trace_start"() <{level = 10 : i32, message = "qd,kd->qk"}> : () -> ()
    %cst_18 = arith.constant dense<0.000000e+00> : vector<8x8xf32>
    %36 = tpu.matmul %33, %34, %cst_18 {dimension_numbers = #tpu.dot_dimension_numbers<[1], [1], [0], [0], [0, 0, 1, 0], [], []>} : vector<8x8xbf16>, vector<8x8xbf16>, vector<8x8xf32> -> vector<8x8xf32>
    "tpu.trace_stop"() : () -> ()
    %cst_19 = arith.constant dense<0xFF800000> : vector<8xf32>
    %37 = vector.multi_reduction <maximumf>, %36, %cst_19 [1] : vector<8x8xf32> to vector<8xf32>
    %38 = vector.shape_cast %37 : vector<8xf32> to vector<8x1xf32>
    %39 = vector.broadcast %38 : vector<8x1xf32> to vector<8x8xf32>
    %40 = arith.subf %36, %39 : vector<8x8xf32>
    %41 = math.exp %40 : vector<8x8xf32>
    %cst_20 = arith.constant dense<0.000000e+00> : vector<8xf32>
    %42 = vector.multi_reduction <add>, %41, %cst_20 [1] : vector<8x8xf32> to vector<8xf32>
    %43 = vector.shape_cast %42 : vector<8xf32> to vector<8x1xf32>
    %44 = vector.broadcast %43 : vector<8x1xf32> to vector<8x8xf32>
    %45 = arith.divf %41, %44 : vector<8x8xf32>
    %46 = arith.addf %29, %45 : vector<8x8xf32>
    %47 = arith.truncf %45 : vector<8x8xf32> to vector<8x8xbf16>
    %cst_21 = arith.constant dense<0.000000e+00> : vector<8x8xf32>
    %48 = tpu.matmul %47, %35, %cst_21 {dimension_numbers = #tpu.dot_dimension_numbers<[1], [0], [0], [1], [0, 0, 1, 1], [], []>} : vector<8x8xbf16>, vector<8x8xbf16>, vector<8x8xf32> -> vector<8x8xf32>
    %c0_22 = arith.constant 0 : index
    %c8_23 = arith.constant 8 : index
    %49 = vector.load %arg20[%c0_22, %c8_23] : memref<8x32xf32, #tpu.memory_space<vmem>>, vector<8x8xf32>
    tpu.vector_store %arg20[%c0_22, %c8_23], %48 {strides = array<i32>} : memref<8x32xf32, #tpu.memory_space<vmem>>, vector<8x8xf32>,
    %50 = vector.extract_strided_slice %16 {offsets = [0, 16], sizes = [8, 8], strides = [1, 1]} : vector<8x32xbf16> to vector<8x8xbf16>
    %c0_24 = arith.constant 0 : index
    %c16 = arith.constant 16 : index
    %51 = vector.load %arg19[%c0_24, %c16] : memref<8x64xbf16, #tpu.memory_space<vmem>>, vector<8x8xbf16>
    %c0_25 = arith.constant 0 : index
    %c48 = arith.constant 48 : index
    %52 = vector.load %arg19[%c0_25, %c48] : memref<8x64xbf16, #tpu.memory_space<vmem>>, vector<8x8xbf16>
    "tpu.trace_start"() <{level = 10 : i32, message = "qd,kd->qk"}> : () -> ()
    %cst_26 = arith.constant dense<0.000000e+00> : vector<8x8xf32>
    %53 = tpu.matmul %50, %51, %cst_26 {dimension_numbers = #tpu.dot_dimension_numbers<[1], [1], [0], [0], [0, 0, 1, 0], [], []>} : vector<8x8xbf16>, vector<8x8xbf16>, vector<8x8xf32> -> vector<8x8xf32>
    "tpu.trace_stop"() : () -> ()
    %cst_27 = arith.constant dense<0xFF800000> : vector<8xf32>
    %54 = vector.multi_reduction <maximumf>, %53, %cst_27 [1] : vector<8x8xf32> to vector<8xf32>
    %55 = vector.shape_cast %54 : vector<8xf32> to vector<8x1xf32>
    %56 = vector.broadcast %55 : vector<8x1xf32> to vector<8x8xf32>
    %57 = arith.subf %53, %56 : vector<8x8xf32>
    %58 = math.exp %57 : vector<8x8xf32>
    %cst_28 = arith.constant dense<0.000000e+00> : vector<8xf32>
    %59 = vector.multi_reduction <add>, %58, %cst_28 [1] : vector<8x8xf32> to vector<8xf32>
    %60 = vector.shape_cast %59 : vector<8xf32> to vector<8x1xf32>
    %61 = vector.broadcast %60 : vector<8x1xf32> to vector<8x8xf32>
    %62 = arith.divf %58, %61 : vector<8x8xf32>
    %63 = arith.addf %46, %62 : vector<8x8xf32>
    %64 = arith.truncf %62 : vector<8x8xf32> to vector<8x8xbf16>
    %cst_29 = arith.constant dense<0.000000e+00> : vector<8x8xf32>
    %65 = tpu.matmul %64, %52, %cst_29 {dimension_numbers = #tpu.dot_dimension_numbers<[1], [0], [0], [1], [0, 0, 1, 1], [], []>} : vector<8x8xbf16>, vector<8x8xbf16>, vector<8x8xf32> -> vector<8x8xf32>
    %c0_30 = arith.constant 0 : index
    %c16_31 = arith.constant 16 : index
    %66 = vector.load %arg20[%c0_30, %c16_31] : memref<8x32xf32, #tpu.memory_space<vmem>>, vector<8x8xf32>
    tpu.vector_store %arg20[%c0_30, %c16_31], %65 {strides = array<i32>} : memref<8x32xf32, #tpu.memory_space<vmem>>, vector<8x8xf32>,
    %67 = vector.extract_strided_slice %16 {offsets = [0, 24], sizes = [8, 8], strides = [1, 1]} : vector<8x32xbf16> to vector<8x8xbf16>
    %c0_32 = arith.constant 0 : index
    %c24 = arith.constant 24 : index
    %68 = vector.load %arg19[%c0_32, %c24] : memref<8x64xbf16, #tpu.memory_space<vmem>>, vector<8x8xbf16>
    %c0_33 = arith.constant 0 : index
    %c56 = arith.constant 56 : index
    %69 = vector.load %arg19[%c0_33, %c56] : memref<8x64xbf16, #tpu.memory_space<vmem>>, vector<8x8xbf16>
    "tpu.trace_start"() <{level = 10 : i32, message = "qd,kd->qk"}> : () -> ()
    %cst_34 = arith.constant dense<0.000000e+00> : vector<8x8xf32>
    %70 = tpu.matmul %67, %68, %cst_34 {dimension_numbers = #tpu.dot_dimension_numbers<[1], [1], [0], [0], [0, 0, 1, 0], [], []>} : vector<8x8xbf16>, vector<8x8xbf16>, vector<8x8xf32> -> vector<8x8xf32>
    "tpu.trace_stop"() : () -> ()
    %cst_35 = arith.constant dense<0xFF800000> : vector<8xf32>
    %71 = vector.multi_reduction <maximumf>, %70, %cst_35 [1] : vector<8x8xf32> to vector<8xf32>
    %72 = vector.shape_cast %71 : vector<8xf32> to vector<8x1xf32>
    %73 = vector.broadcast %72 : vector<8x1xf32> to vector<8x8xf32>
    %74 = arith.subf %70, %73 : vector<8x8xf32>
    %75 = math.exp %74 : vector<8x8xf32>
    %cst_36 = arith.constant dense<0.000000e+00> : vector<8xf32>
    %76 = vector.multi_reduction <add>, %75, %cst_36 [1] : vector<8x8xf32> to vector<8xf32>
    %77 = vector.shape_cast %76 : vector<8xf32> to vector<8x1xf32>
    %78 = vector.broadcast %77 : vector<8x1xf32> to vector<8x8xf32>
    %79 = arith.divf %75, %78 : vector<8x8xf32>
    %80 = arith.addf %63, %79 : vector<8x8xf32>
    %81 = arith.truncf %79 : vector<8x8xf32> to vector<8x8xbf16>
    %cst_37 = arith.constant dense<0.000000e+00> : vector<8x8xf32>
    %82 = tpu.matmul %81, %69, %cst_37 {dimension_numbers = #tpu.dot_dimension_numbers<[1], [0], [0], [1], [0, 0, 1, 1], [], []>} : vector<8x8xbf16>, vector<8x8xbf16>, vector<8x8xf32> -> vector<8x8xf32>
    %c0_38 = arith.constant 0 : index
    %c24_39 = arith.constant 24 : index
    %83 = vector.load %arg20[%c0_38, %c24_39] : memref<8x32xf32, #tpu.memory_space<vmem>>, vector<8x8xf32>
    tpu.vector_store %arg20[%c0_38, %c24_39], %82 {strides = array<i32>} : memref<8x32xf32, #tpu.memory_space<vmem>>, vector<8x8xf32>,
    %cst_40 = arith.constant 2.500000e-01 : f32
    %84 = vector.broadcast %cst_40 : f32 to vector<8x8xf32>
    %85 = arith.mulf %80, %84 : vector<8x8xf32>
    %c0_41 = arith.constant 0 : index
    %c0_42 = arith.constant 0 : index
    %c0_43 = arith.constant 0 : index
    %86 = vector.load %arg18[%c0_41, %c0_42, %c0_43] : memref<1x8x8xf32, #tpu.memory_space<vmem>>, vector<1x8x8xf32>
    %87 = vector.shape_cast %86 : vector<1x8x8xf32> to vector<8x8xf32>
    %88 = vector.shape_cast %85 : vector<8x8xf32> to vector<1x8x8xf32>
    tpu.vector_store %arg18[%c0_41, %c0_42, %c0_43], %88 {strides = array<i32>} : memref<1x8x8xf32, #tpu.memory_space<vmem>>, vector<1x8x8xf32>,
    %c0_44 = arith.constant 0 : index
    %c0_45 = arith.constant 0 : index
    %89 = vector.load %arg20[%c0_44, %c0_45] : memref<8x32xf32, #tpu.memory_space<vmem>>, vector<8x32xf32>
    %90 = arith.truncf %89 : vector<8x32xf32> to vector<8x32xbf16>
    %c0_46 = arith.constant 0 : index
    %c0_47 = arith.constant 0 : index
    %91 = vector.load %arg7[%c0_46, %c0_47] : memref<32x32xbf16, #tpu.memory_space<vmem>>, vector<32x32xbf16>
    %cst_48 = arith.constant dense<0.000000e+00> : vector<8x32xf32>
    %92 = tpu.matmul %90, %91, %cst_48 {dimension_numbers = #tpu.dot_dimension_numbers<[1], [0], [0], [1], [0, 0, 1, 1], [], []>} : vector<8x32xbf16>, vector<32x32xbf16>, vector<8x32xf32> -> vector<8x32xf32>
    %c0_49 = arith.constant 0 : index
    %c0_50 = arith.constant 0 : index
    %93 = vector.load %arg8[%c0_49, %c0_50] : memref<1x32xf32, #tpu.memory_space<vmem>>, vector<1x32xf32>
    %94 = vector.broadcast %93 : vector<1x32xf32> to vector<8x32xf32>
    %95 = arith.addf %92, %94 : vector<8x32xf32>
    %96 = arith.addf %7, %95 : vector<8x32xf32>
    %cst_51 = arith.constant dense<0.000000e+00> : vector<8xf32>
    %97 = vector.multi_reduction <add>, %96, %cst_51 [1] : vector<8x32xf32> to vector<8xf32>
    %98 = vector.shape_cast %97 : vector<8xf32> to vector<8x1xf32>
    %cst_52 = arith.constant 3.200000e+01 : f32
    %99 = vector.broadcast %cst_52 : f32 to vector<8x1xf32>
    %100 = arith.divf %98, %99 : vector<8x1xf32>
    %101 = vector.broadcast %100 : vector<8x1xf32> to vector<8x32xf32>
    %102 = arith.subf %96, %101 : vector<8x32xf32>
    %103 = arith.mulf %102, %102 : vector<8x32xf32>
    %cst_53 = arith.constant dense<0.000000e+00> : vector<8xf32>
    %104 = vector.multi_reduction <add>, %103, %cst_53 [1] : vector<8x32xf32> to vector<8xf32>
    %105 = vector.shape_cast %104 : vector<8xf32> to vector<8x1xf32>
    %cst_54 = arith.constant 3.200000e+01 : f32
    %106 = vector.broadcast %cst_54 : f32 to vector<8x1xf32>
    %107 = arith.divf %105, %106 : vector<8x1xf32>
    %108 = vector.broadcast %100 : vector<8x1xf32> to vector<8x32xf32>
    %109 = arith.subf %96, %108 : vector<8x32xf32>
    %cst_55 = arith.constant 9.99999974E-6 : f32
    %110 = vector.broadcast %cst_55 : f32 to vector<8x1xf32>
    %111 = arith.addf %107, %110 : vector<8x1xf32>
    %112 = math.rsqrt %111 : vector<8x1xf32>
    %113 = vector.broadcast %112 : vector<8x1xf32> to vector<8x32xf32>
    %114 = arith.mulf %109, %113 : vector<8x32xf32>
    %c0_56 = arith.constant 0 : index
    %c0_57 = arith.constant 0 : index
    %115 = vector.load %arg13[%c0_56, %c0_57] : memref<1x32xf32, #tpu.memory_space<vmem>>, vector<1x32xf32>
    %116 = vector.broadcast %115 : vector<1x32xf32> to vector<8x32xf32>
    %117 = arith.mulf %114, %116 : vector<8x32xf32>
    %c0_58 = arith.constant 0 : index
    %c0_59 = arith.constant 0 : index
    %118 = vector.load %arg14[%c0_58, %c0_59] : memref<1x32xf32, #tpu.memory_space<vmem>>, vector<1x32xf32>
    %119 = vector.broadcast %118 : vector<1x32xf32> to vector<8x32xf32>
    %120 = arith.addf %117, %119 : vector<8x32xf32>
    %121 = arith.truncf %120 : vector<8x32xf32> to vector<8x32xbf16>
    %c0_60 = arith.constant 0 : index
    %c0_61 = arith.constant 0 : index
    %122 = vector.load %arg9[%c0_60, %c0_61] : memref<32x64xbf16, #tpu.memory_space<vmem>>, vector<32x64xbf16>
    %cst_62 = arith.constant dense<0.000000e+00> : vector<8x64xf32>
    %123 = tpu.matmul %121, %122, %cst_62 {dimension_numbers = #tpu.dot_dimension_numbers<[1], [0], [0], [1], [0, 0, 1, 1], [], []>} : vector<8x32xbf16>, vector<32x64xbf16>, vector<8x64xf32> -> vector<8x64xf32>
    %c0_63 = arith.constant 0 : index
    %c0_64 = arith.constant 0 : index
    %124 = vector.load %arg10[%c0_63, %c0_64] : memref<1x64xf32, #tpu.memory_space<vmem>>, vector<1x64xf32>
    %125 = vector.broadcast %124 : vector<1x64xf32> to vector<8x64xf32>
    %126 = arith.addf %123, %125 : vector<8x64xf32>
    %cst_65 = arith.constant 0.000000e+00 : f32
    %127 = vector.broadcast %cst_65 : f32 to vector<8x64xf32>
    %128 = arith.maximumf %126, %127 : vector<8x64xf32>
    %129 = arith.truncf %128 : vector<8x64xf32> to vector<8x64xbf16>
    %c0_66 = arith.constant 0 : index
    %c0_67 = arith.constant 0 : index
    %130 = vector.load %arg11[%c0_66, %c0_67] : memref<64x32xbf16, #tpu.memory_space<vmem>>, vector<64x32xbf16>
    %cst_68 = arith.constant dense<0.000000e+00> : vector<8x32xf32>
    %131 = tpu.matmul %129, %130, %cst_68 {dimension_numbers = #tpu.dot_dimension_numbers<[1], [0], [0], [1], [0, 0, 1, 1], [], []>} : vector<8x64xbf16>, vector<64x32xbf16>, vector<8x32xf32> -> vector<8x32xf32>
    %c0_69 = arith.constant 0 : index
    %c0_70 = arith.constant 0 : index
    %132 = vector.load %arg12[%c0_69, %c0_70] : memref<1x32xf32, #tpu.memory_space<vmem>>, vector<1x32xf32>
    %133 = vector.broadcast %132 : vector<1x32xf32> to vector<8x32xf32>
    %134 = arith.addf %131, %133 : vector<8x32xf32>
    %135 = arith.addf %120, %134 : vector<8x32xf32>
    %cst_71 = arith.constant dense<0.000000e+00> : vector<8xf32>
    %136 = vector.multi_reduction <add>, %135, %cst_71 [1] : vector<8x32xf32> to vector<8xf32>
    %137 = vector.shape_cast %136 : vector<8xf32> to vector<8x1xf32>
    %cst_72 = arith.constant 3.200000e+01 : f32
    %138 = vector.broadcast %cst_72 : f32 to vector<8x1xf32>
    %139 = arith.divf %137, %138 : vector<8x1xf32>
    %140 = vector.broadcast %139 : vector<8x1xf32> to vector<8x32xf32>
    %141 = arith.subf %135, %140 : vector<8x32xf32>
    %142 = arith.mulf %141, %141 : vector<8x32xf32>
    %cst_73 = arith.constant dense<0.000000e+00> : vector<8xf32>
    %143 = vector.multi_reduction <add>, %142, %cst_73 [1] : vector<8x32xf32> to vector<8xf32>
    %144 = vector.shape_cast %143 : vector<8xf32> to vector<8x1xf32>
    %cst_74 = arith.constant 3.200000e+01 : f32
    %145 = vector.broadcast %cst_74 : f32 to vector<8x1xf32>
    %146 = arith.divf %144, %145 : vector<8x1xf32>
    %147 = vector.broadcast %139 : vector<8x1xf32> to vector<8x32xf32>
    %148 = arith.subf %135, %147 : vector<8x32xf32>
    %cst_75 = arith.constant 9.99999974E-6 : f32
    %149 = vector.broadcast %cst_75 : f32 to vector<8x1xf32>
    %150 = arith.addf %146, %149 : vector<8x1xf32>
    %151 = math.rsqrt %150 : vector<8x1xf32>
    %152 = vector.broadcast %151 : vector<8x1xf32> to vector<8x32xf32>
    %153 = arith.mulf %148, %152 : vector<8x32xf32>
    %c0_76 = arith.constant 0 : index
    %c0_77 = arith.constant 0 : index
    %154 = vector.load %arg15[%c0_76, %c0_77] : memref<1x32xf32, #tpu.memory_space<vmem>>, vector<1x32xf32>
    %155 = vector.broadcast %154 : vector<1x32xf32> to vector<8x32xf32>
    %156 = arith.mulf %153, %155 : vector<8x32xf32>
    %c0_78 = arith.constant 0 : index
    %c0_79 = arith.constant 0 : index
    %157 = vector.load %arg16[%c0_78, %c0_79] : memref<1x32xf32, #tpu.memory_space<vmem>>, vector<1x32xf32>
    %158 = vector.broadcast %157 : vector<1x32xf32> to vector<8x32xf32>
    %159 = arith.addf %156, %158 : vector<8x32xf32>
    %c0_80 = arith.constant 0 : index
    %c0_81 = arith.constant 0 : index
    %c0_82 = arith.constant 0 : index
    %160 = vector.load %arg17[%c0_80, %c0_81, %c0_82] : memref<1x8x32xf32, #tpu.memory_space<vmem>>, vector<1x8x32xf32>
    %161 = vector.shape_cast %160 : vector<1x8x32xf32> to vector<8x32xf32>
    %162 = vector.shape_cast %159 : vector<8x32xf32> to vector<1x8x32xf32>
    tpu.vector_store %arg17[%c0_80, %c0_81, %c0_82], %162 {strides = array<i32>} : memref<1x8x32xf32, #tpu.memory_space<vmem>>, vector<1x8x32xf32>,
    return
  }
  func.func @transform_0(%arg0: i32, %arg1: i32) -> (i32, i32, i32) {
    %c0_i32 = arith.constant 0 : i32
    %c0_i32_0 = arith.constant 0 : i32
    %c0_i32_1 = arith.constant 0 : i32
    return %arg0, %c0_i32, %c0_i32_0 : i32, i32, i32
  }
  func.func @transform_1(%arg0: i32, %arg1: i32) -> (i32, i32) {
    %c0_i32 = arith.constant 0 : i32
    %c0_i32_0 = arith.constant 0 : i32
    %c0_i32_1 = arith.constant 0 : i32
    return %c0_i32, %c0_i32_0 : i32, i32
  }
  func.func @transform_2(%arg0: i32, %arg1: i32) -> (i32, i32) {
    %c0_i32 = arith.constant 0 : i32
    %c0_i32_0 = arith.constant 0 : i32
    %c0_i32_1 = arith.constant 0 : i32
    return %c0_i32, %c0_i32_0 : i32, i32
  }
  func.func @transform_3(%arg0: i32, %arg1: i32) -> (i32, i32) {
    %c0_i32 = arith.constant 0 : i32
    %c0_i32_0 = arith.constant 0 : i32
    %c0_i32_1 = arith.constant 0 : i32
    return %c0_i32, %c0_i32_0 : i32, i32
  }
  func.func @transform_4(%arg0: i32, %arg1: i32) -> (i32, i32) {
    %c0_i32 = arith.constant 0 : i32
    %c0_i32_0 = arith.constant 0 : i32
    %c0_i32_1 = arith.constant 0 : i32
    return %c0_i32, %c0_i32_0 : i32, i32
  }
  func.func @transform_5(%arg0: i32, %arg1: i32) -> (i32, i32) {
    %c0_i32 = arith.constant 0 : i32
    %c0_i32_0 = arith.constant 0 : i32
    %c0_i32_1 = arith.constant 0 : i32
    return %c0_i32, %c0_i32_0 : i32, i32
  }
  func.func @transform_6(%arg0: i32, %arg1: i32) -> (i32, i32) {
    %c0_i32 = arith.constant 0 : i32
    %c0_i32_0 = arith.constant 0 : i32
    %c0_i32_1 = arith.constant 0 : i32
    return %c0_i32, %c0_i32_0 : i32, i32
  }
  func.func @transform_7(%arg0: i32, %arg1: i32) -> (i32, i32) {
    %c0_i32 = arith.constant 0 : i32
    %c0_i32_0 = arith.constant 0 : i32
    %c0_i32_1 = arith.constant 0 : i32
    return %c0_i32, %c0_i32_0 : i32, i32
  }
  func.func @transform_8(%arg0: i32, %arg1: i32) -> (i32, i32) {
    %c0_i32 = arith.constant 0 : i32
    %c0_i32_0 = arith.constant 0 : i32
    %c0_i32_1 = arith.constant 0 : i32
    return %c0_i32, %c0_i32_0 : i32, i32
  }
  func.func @transform_9(%arg0: i32, %arg1: i32) -> (i32, i32) {
    %c0_i32 = arith.constant 0 : i32
    %c0_i32_0 = arith.constant 0 : i32
    %c0_i32_1 = arith.constant 0 : i32
    return %c0_i32, %c0_i32_0 : i32, i32
  }
  func.func @transform_10(%arg0: i32, %arg1: i32) -> (i32, i32) {
    %c0_i32 = arith.constant 0 : i32
    %c0_i32_0 = arith.constant 0 : i32
    %c0_i32_1 = arith.constant 0 : i32
    return %c0_i32, %c0_i32_0 : i32, i32
  }
  func.func @transform_11(%arg0: i32, %arg1: i32) -> (i32, i32) {
    %c0_i32 = arith.constant 0 : i32
    %c0_i32_0 = arith.constant 0 : i32
    %c0_i32_1 = arith.constant 0 : i32
    return %c0_i32, %c0_i32_0 : i32, i32
  }
  func.func @transform_12(%arg0: i32, %arg1: i32) -> (i32, i32) {
    %c0_i32 = arith.constant 0 : i32
    %c0_i32_0 = arith.constant 0 : i32
    %c0_i32_1 = arith.constant 0 : i32
    return %c0_i32, %c0_i32_0 : i32, i32
  }
  func.func @transform_13(%arg0: i32, %arg1: i32) -> (i32, i32) {
    %c0_i32 = arith.constant 0 : i32
    %c0_i32_0 = arith.constant 0 : i32
    %c0_i32_1 = arith.constant 0 : i32
    return %c0_i32, %c0_i32_0 : i32, i32
  }
  func.func @transform_14(%arg0: i32, %arg1: i32) -> (i32, i32) {
    %c0_i32 = arith.constant 0 : i32
    %c0_i32_0 = arith.constant 0 : i32
    %c0_i32_1 = arith.constant 0 : i32
    return %c0_i32, %c0_i32_0 : i32, i32
  }
  func.func @transform_15(%arg0: i32, %arg1: i32) -> (i32, i32, i32) {
    %c0_i32 = arith.constant 0 : i32
    %c0_i32_0 = arith.constant 0 : i32
    return %arg0, %arg1, %c0_i32 : i32, i32, i32
  }
  func.func @transform_16(%arg0: i32, %arg1: i32) -> (i32, i32, i32) {
    %c0_i32 = arith.constant 0 : i32
    %c0_i32_0 = arith.constant 0 : i32
    return %arg0, %arg1, %c0_i32 : i32, i32, i32
  }
}

</mosaic_0001>

<bundles_post_ra>
// kernel: tpu_custom_call.1
= control target key start
LH: loop header
LB: loop body
LE: loop exit
PB: predicated region body
PF: predicated region fallthrough
CT: control target
= control target key end

     0   :  { %s2615_s0 = inlined_call_operand.vmem [shape: f32[2,8,32], index: 0, kind: input, shape index: {}]   ;;  %s2616_s1 = inlined_call_operand.vmem [shape: bf16[32,32], index: 1, kind: input, shape index: {}]   ;;  %s2617_s2 = inlined_call_operand.vmem [shape: f32[1,32], index: 2, kind: input, shape index: {}]   ;;  %s2618_s3 = inlined_call_operand.vmem [shape: bf16[32,64], index: 3, kind: input, shape index: {}]   ;;  %s2619_s4 = inlined_call_operand.vmem [shape: f32[1,64], index: 4, kind: input, shape index: {}]   ;;  %s2620_s5 = inlined_call_operand.hbm [shape: bf16[32,32], index: 5, kind: input, shape index: {}]   ;;  %s2621_s6 = inlined_call_operand.vmem [shape: f32[1,32], index: 6, kind: input, shape index: {}]   ;;  %s2622_s7 = inlined_call_operand.hbm [shape: bf16[32,64], index: 7, kind: input, shape index: {}]   ;;  %s2623_s8 = inlined_call_operand.vmem [shape: f32[1,64], index: 8, kind: input, shape index: {}]   ;;  %s2624_s9 = inlined_call_operand.vmem [shape: bf16[64,32], index: 9, kind: input, shape index: {}]   ;;  %s2625_s10 = inlined_call_operand.vmem [shape: f32[1,32], index: 10, kind: input, shape index: {}]   ;;  %s2626_s11 = inlined_call_operand.vmem [shape: f32[1,32], index: 11, kind: input, shape index: {}]   ;;  %s2627_s12 = inlined_call_operand.vmem [shape: f32[1,32], index: 12, kind: input, shape index: {}]   ;;  %s2628_s13 = inlined_call_operand.vmem [shape: f32[1,32], index: 13, kind: input, shape index: {}]   ;;  %s2629_s14 = inlined_call_operand.vmem [shape: f32[1,32], index: 14, kind: input, shape index: {}]   ;;  %s2630_s15 = inlined_call_operand.hbm [shape: f32[2,8,32], index: 15, kind: output, shape index: {0}]   ;;  %s2631_s16 = inlined_call_operand.hbm [shape: f32[2,8,8], index: 16, kind: output, shape index: {1}]  }
   0x1   :  { %2645 = sst [smem:[#allocation23_spill]] %s2615_s0 }
   0x2   :  { %2646 = sst [smem:[#allocation24_spill]] %s2628_s13 }
   0x3   :  { %2647 = sst [smem:[#allocation25_spill]] %s2629_s14 }
   0x4   :  { %2648 = sst [smem:[#allocation26_spill]] %s2630_s15 }
   0x5   :  { %2649 = sst [smem:[#allocation27_spill]] %s2631_s16 }
   0x6   :  { %22 = vsyncpa [#allocation5], 0 }
   0x7   :  { %23 = vsyncpa [#allocation8], 0 }
   0x8   :  { %24 = vsyncpa [#allocation6], 0 }
   0x9   :  { %26 = vsyncpa [#allocation6 + $0x1], 0 }
   0xa   :  { %27 = vsyncpa [#allocation11], 0 }
   0xb   :  { %29 = vsyncpa [#allocation11 + $0x1], 0  ;;  %s2235_s21 = smov 0   ;;  %s2237_s22 = smov 0  }
   0xc   :  { %s2239_s23 = smov 0   ;;  %s2241_s24 = smov 0  }
   0xd   :  { %s2243_s25 = smov 0   ;;  %s2245_s26 = smov 0  }
   0xe LB: > { %2650 = sst [smem:[#allocation16_spill]] %s2110_s21  ;;  %s1644_s27 = sadd.s32 4294967295, %s2130_s26   ;;  %s2130_s26 = sphi %s2245_s26, %s35_s26   ;;  %s2126_s25 = sphi %s2243_s25, %s2677_s25   ;;  %s2122_s24 = sphi %s2241_s24, %s2676_s24   ;;  %s2118_s23 = sphi %s2239_s23, %s2675_s23   ;;  %s2114_s22 = sphi %s2237_s22, %s2679_s22   ;;  %s2110_s21 = sphi %s2235_s21, %s2678_s21  }
   0xf   : > { %2651 = sst [smem:[#allocation17_spill]] %s2118_s23  ;;  %s1645_s28 = sadd.s32 4294967294, %s2130_s26  }
  0x10   : > { %2652 = sst [smem:[#allocation18_spill]] %s2126_s25  ;;  %s47_s29 = sadd.s32 1, %s2126_s25 }
  0x11   : > { %2653 = sst [smem:[#allocation19_spill]] %s2130_s26  ;;  %s376_s30 = sadd.s32 1, %s2118_s23 }
  0x12   : > { %p49_p0 = scmp.ge.s32.totalorder %s47_s29, 2  ;;  %p386_p1 = scmp.ne.s32.totalorder %s2118_s23, %s2114_s22 }
  0x13   : > { %p387_p2 = scmp.eq.s32.totalorder %s1644_s27, 1  ;;  %p392_p3 = scmp.ne.s32.totalorder %s2114_s22, %s2110_s21 }
  0x14   : > { %s2681_s29 = smov (%p49_p0, %s47_s29), 0  ;;  %p393_p5 = scmp.eq.s32.totalorder %s1645_s28, 1 }
  0x15   : > { %2654 = sst [smem:[#allocation20_spill]] %s2681_s29  ;;  %p2275_p4 = por %p387_p2, %p386_p1 }
  0x16   : > { %s371_s17 = ssub.s32 %s2126_s25, %s2681_s29  ;;  %p1646_p6 = scmp.ge.s32.totalorder %s2130_s26, 1 }
  0x17   : > { %s2655_s0 = scalar_select %p2275_p4, 1, 0 }
  0x18   : > { %p374_p7 = scmp.eq.s32.totalorder %s371_s17, 0  ;;  %p2282_p8 = por %p393_p5, %p392_p3 }
  0x19   : > { %p428_p9 = scmp.lt.s32.totalorder %s2130_s26, 3  ;;  %p2294_p11 = scmp.eq.s32.totalorder %s1644_s27, 0 }
  0x1a   : > { %s2656_s18 = scalar_select %p2282_p8, 1, 0 }
  0x1b   : > { %s2288_s19 = scalar_select %p374_p7, %s2118_s23, %s376_s30  }
  0x1c   : > { %2657 = sst [smem:[#allocation21_spill]] %s2656_s18  ;;  %p2290_p10 = pnand %p1646_p6, %p428_p9 }
  0x1d   : > { %2658 = sst [smem:[#allocation22_spill]] %s2288_s19  ;;  %s2132_s28 = smov [#allocation4]  }
  0x1e   : > { %s2659_s20 = scalar_select %p2290_p10, 1, 0 }
  0x1f   : > { %s2660_s21 = scalar_select %p2294_p11, 1, 0 }
  0x20   : > { %p1837_p12 = pneg %p2290_p10  ;;  %s452_s17 = sshll.u32 %s2132_s28, 4  ;;  %s453_s17 = int_to_ptr.vmem [resolvable:$true] %s452_s17 }
  0x21   : > { %s2133_s30 = smov [#allocation7]   ;;  %s1956_s23 = scalar_lea.hbm %s2620_s5, 256 }
  0x22   : > { %p2302_p13 = pnand %p2294_p11, %p1837_p12  ;;  %s468_s25 = sshll.u32 %s2133_s30, 4  ;;  %s2306_s25 = int_to_ptr.vmem [resolvable:$true] %s468_s25 }
  0x23   : > { %p1957_p0 = scmp.ne.s32.totalorder %s2620_s5, %s1956_s23  ;;  %p1963_p5 = scmp.lt.u32.totalorder %s1956_s23, %s2620_s5 }
  0x24   : > { %p1958_p1 = pneg %p2302_p13 }
  0x26   : > { %p1959_p2 = pnand %p1958_p1, %p1957_p0 }
  0x28   : > { %p1960_p3 = pneg %p1959_p2 }
  0x2a   : > { %p1965_p6 = pnand %p1963_p5, %p1960_p3 }
  0x2c   : > { %1968 = shalt.err (!%p1965_p6)
}
  0x2d   : > { %s1969_s30 = scalar_lea.vmem %s453_s17, 256  ;;  %p1977_p8 = scmp.lt.s32.totalorder %s453_s17, %s453_s17 }
  0x2e   : > { %p1970_p7 = scmp.ne.s32.totalorder %s453_s17, %s1969_s30  ;;  %p1978_p4 = scmp.lt.s32.totalorder %s1969_s30, %s1969_s30 }
  0x30   : > { %p1972_p9 = pnand %p1970_p7, %p1958_p1  ;;  %p1979_p11 = por %p1978_p4, %p1977_p8 }
  0x32   : > { %p1973_p12 = pneg %p1972_p9 }
  0x34   : > { %p1980_p10 = pnand %p1979_p11, %p1973_p12 }
  0x36   : > { %1983 = shalt.err (!%p1980_p10)
}
  0x37   : > { %s2134_s26 = smov 64   ;;  %s2135_s18 = smov 4  }
  0x38   : > { %1840 = dma.hbm_to_vmem [thread:$0]  (!%p2302_p13), %s2620_s5, 256, %s453_s17, [#allocation5], %s2134_s26, %s2134_s26, %s2135_s18  }
  0x39   : > { %s1984_s28 = scalar_lea.hbm %s2622_s7, 256 }
  0x3a   : > { %p1985_p0 = scmp.ne.s32.totalorder %s2622_s7, %s1984_s28  ;;  %p1991_p10 = scmp.lt.u32.totalorder %s1984_s28, %s2622_s7 }
  0x3c   : > { %p1987_p4 = pnand %p1985_p0, %p1958_p1 }
  0x3e   : > { %p1988_p8 = pneg %p1987_p4 }
  0x40   : > { %p1993_p11 = pnand %p1991_p10, %p1988_p8 }
  0x42   : > { %1996 = shalt.err (!%p1993_p11)
}
  0x43   : > { %s1997_s17 = scalar_lea.vmem %s2306_s25, 256  ;;  %p2005_p6 = scmp.lt.s32.totalorder %s2306_s25, %s2306_s25 }
  0x44   : > { %p1998_p2 = scmp.ne.s32.totalorder %s2306_s25, %s1997_s17  ;;  %p2006_p7 = scmp.lt.s32.totalorder %s1997_s17, %s1997_s17 }
  0x46   : > { %p2000_p3 = pnand %p1998_p2, %p1958_p1  ;;  %p2007_p9 = por %p2006_p7, %p2005_p6 }
  0x48   : > { %p2001_p5 = pneg %p2000_p3 }
  0x4a   : > { %p2008_p12 = pnand %p2007_p9, %p2001_p5 }
  0x4c   : > { %2011 = shalt.err (!%p2008_p12)
}
  0x4d   : > { %1843 = dma.hbm_to_vmem [thread:$0]  (!%p2302_p13), %s2622_s7, 256, %s2306_s25, [#allocation8], %s2134_s26, %s2134_s26, %s2135_s18  }
  0x4e   : > { %p2662_p0 = scmp.ne.s32.totalorder %s2659_s20, 0 }
  0x4f   : > { %p2663_p4 = scmp.ne.s32.totalorder (!%p2662_p0), %s2660_s21, 0 }
  0x50   : > { %512 = sbr.rel (%p2662_p0) target bundleno = 2631 (0xa47), region = 80 }
  0x57   : > { %2093 = dma.done.wait (%p2663_p4), [#allocation5], 256  }
  0x58   : > { %2095 = vsyncadd (%p2663_p4), [#allocation5], 4294967040 }
  0x59   : > { %2097 = dma.done.wait (%p2663_p4), [#allocation8], 256  }
  0x5a   : > { %2099 = vsyncadd (%p2663_p4), [#allocation8], 4294967040  ;;  %p570_p1 = scmp.lt.s32.totalorder %s2122_s24, 1  ;;  %v2136_v0 = vmov 0.0   ;;  %vm2137_vm0 = vmmov 0   ;;  %s2664_s20 = sld [smem:[#allocation23_spill]] }
  0x5b   : > { %1733 = vmatprep.subr.bf16.mxu1 %v2136_v0  ;;  %1737 = vmatprep.mubr.msk.bf16.mxu1 %vm2137_vm0, %v2136_v0  ;;  %v1920_v1 = vld [vmem:[%s2618_s3] sm:$0xff]   ;;  %v1921_v2 = vld [vmem:[%s2618_s3 + $0x8] sm:$0xff]   ;;  %vm604_vm1 = vcmask 261120   ;;  %vm649_vm2 = vcmask 519168   ;;  %vm725_vm3 = vcmask 64512   ;;  %s2138_s29 = smov 112  }
  0x5c   : > { %s571_s16 = scalar_select %p570_p1, %s2122_s24, 1  ;;  %1749 = vmatprep.subr.bf16.mxu0 %v2136_v0  ;;  %1751 = vmatprep.mubr.msk.bf16.mxu0 %vm2137_vm0, %v2136_v0  ;;  %v1922_v4 = vld [vmem:[%s2616_s1] sm:$0xff]   ;;  %v1923_v6 = vld [vmem:[%s2616_s1 + $0x8] sm:$0xff]   ;;  %vm792_vm4 = vcmask 1043456   ;;  %vm957_vm5 = vcmask 130112   ;;  %vm1078_vm6 = vcmask 195712  }
  0x5d   : > { %1734 = vmatpush3.bf16.msra.mxu1 %v1920_v1  ;;  %v1656_v7 = vld [vmem:[%s2619_s4] ss:$0 sm:$0xff]  ;;  %s2139_s21 = smov 120   ;;  %s2142_s18 = smov 80   ;;  %vm1199_vm7 = vcmask 261312   ;;  %vm1410_vm8 = vcmask 523264  }
  0x5e   : > { %s1655_s25 = sshll.u32 %s571_s16, 3  ;;  %1735 = vmatprep.subr.bf16.mxu1 %v2136_v0  ;;  %v1660_v14 = vld [vmem:[%s2617_s2] ss:$0 sm:$0xff]  ;;  %s2143_s15 = smov 72  }
  0x5f   : > { %s2144_s23 = smov 88   ;;  %s2463_s19 = sand.u32 1, %s2114_s22  }
  0x60   : > { %s573_s26 = scalar_lea.vmem %s2664_s20, %s1655_s25  ;;  %s2140_s20 = smov 104  }
  0x61   : > { %v2382_v3 = vld [vmem:[%s573_s26] sm:$0xff]  ;;  %1736 = vmatpush3.bf16.msra.mxu1 %v1921_v2  ;;  %s2141_s26 = smov 96   ;;  %s1653_s27 = sshll.u32 %s2463_s19, 3 }
  0x62   : > { %v580_v5 = vpack.c.bf16 %v2382_v3, %v2382_v3  ;;  %1741 = vmatprep.subr.bf16.mxu1 %v2136_v0  ;;  %s2475_s28 = scalar_lea.vmem [#allocation10], %s1653_s27  ;;  %s2145_s30 = smov 8  }
  0x63   : > { %s2146_s17 = smov 16   ;;  %s2147_s13 = smov 24  }
  0x64   : > { %1738 = vmatmul.mubr.msk.bf16.vlgmr.msra.gmra.mrb[0].mxu1 %vm604_vm1, %v580_v5  ;;  %p2666_p8 = scmp.ne.s32.totalorder %s2655_s0, 0  ;;  %s2148_s14 = smov [#allocation10]  }
  0x65   : > { %1742 = vmatpush3.bf16.msra.mxu1 %v1922_v4  ;;  %1745 = vmatprep.mubr.msk.bf16.mxu1 %vm2137_vm0, %v2136_v0  ;;  %s2016_s16 = sshll.u32 %s2148_s14, 4  ;;  %s2017_s16 = int_to_ptr.vmem [resolvable:$false] %s2016_s16 }
  0x66   : > { %1743 = vmatprep.subr.bf16.mxu1 %v2136_v0  ;;  %s2018_s25 = scalar_lea.vmem %s2017_s16, 256 }
  0x69   : > { %1744 = vmatpush3.bf16.msra.mxu1 %v1923_v6 }
  0x6a   : > { %1755 = vmatprep.subr.bf16.mxu1 %v2136_v0 }
  0x6c   : > { %1746 = vmatmul.mubr.msk.bf16.vlgmr.msra.gmra.mrb[4].mxu1 %vm604_vm1, %v580_v5 }
  0x6d   : > { %1757 = vmatprep.mubr.msk.bf16.mxu1 %vm2137_vm0, %v2136_v0 }
 0x137   : > { %v642_v8 = vpop.f32.mrb[0].mxu1 }
 0x138   : > { %v643_v9 = vadd.f32 %v1656_v7, %v642_v8  ;;  %v1739_v10 = vpop.f32.mrb[1].mxu1 }
 0x139   : > { %v645_v11 = vpop.f32.mrb[2].mxu1 }
 0x13a   : > { %v648_v12 = vpack.c.bf16 %v643_v9, %v643_v9  ;;  %v1740_v13 = vpop.f32.mrb[3].mxu1 }
 0x13c   : > { %650 = vst.msk [vmem:[#allocation2] sm:$0xf] %vm649_vm2, %v648_v12 }
 0x13f   : > { %v716_v15 = vpop.f32.mrb[4].mxu1 }
 0x140   : > { %v717_v16 = vadd.f32 %v1660_v14, %v716_v15  ;;  %v1747_v17 = vpop.f32.mrb[5].mxu1 }
 0x141   : > { %v719_v18 = vpop.f32.mrb[6].mxu1 }
 0x142   : > { %v722_v19 = vmul.f32 0.35355338, %v717_v16  ;;  %v1748_v20 = vpop.f32.mrb[7].mxu1 }
 0x143   : > { %v2408_v21 = vld [vmem:[#allocation2] sm:$0xf] }
 0x144   : > { %v2410_v22 = vld [vmem:[#allocation2] ss:$0 sps:$4 sm:$0xff]   ;;  %v730_v23 = vsel %vm725_vm3, %v2408_v21, 0  ;;  %v723_v25 = vpack.c.bf16 %v722_v19, %v722_v19  ;;  %v1665_v61 = vcombine.low %v2408_v21, %v2408_v21 }
 0x145   : > { %v2414_v24 = vld [vmem:[#allocation2] ss:$0 sps:$4 sm:$0xff]   ;;  %1750 = vmatpush3.bf16.xpose.msra.mxu0 %v730_v23  ;;  %965 = vrot.lane.b32.xlu1 %v2410_v22, %s2138_s29 }
 0x146   : > { %844 = vrot.lane.b32.xlu0 %v2414_v24, %s2139_s21  ;;  %1761 = vmatprep.subr.bf16.mxu0 %v2136_v0  ;;  %v2420_v26 = vld [vmem:[#allocation2] ss:$0 sps:$4 sm:$0xff]  }
 0x149   : > { %960 = vrot.lane.b32.xlu1 %v723_v25, %s2138_s29 }
 0x14a   : > { %839 = vrot.lane.b32.xlu0 %v723_v25, %s2139_s21 }
 0x14c   : > { %1752 = vmatmul.mubr.msk.bf16.vlgmr.msra.gmra.mrb[0].mxu0 %vm725_vm3, %v723_v25 }
 0x14d   : > { %1081 = vrot.lane.b32.xlu1 %v723_v25, %s2140_s20  ;;  %1763 = vmatprep.mubr.msk.bf16.mxu0 %vm2137_vm0, %v2136_v0 }
 0x14e   : > { %1086 = vrot.lane.b32.xlu0 %v2420_v26, %s2140_s20  ;;  %s1696_s20 = sshll.u32 %s2122_s24, 7 }
 0x1b7   : > { %v966_v29 = vpop.permute.xlu1 %965 }
 0x1b8   : > { %v845_v27 = vpop.permute.xlu0 %844  ;;  %v971_v31 = vsel %vm725_vm3, %v966_v29, 0 }
 0x1b9   : > { %v850_v28 = vsel %vm725_vm3, %v845_v27, 0 }
 0x1ba   : > { %1762 = vmatpush3.bf16.xpose.msra.mxu0 %v850_v28 }
 0x1bb   : > { %1773 = vmatprep.subr.bf16.mxu0 %v2136_v0  ;;  %v961_v33 = vpop.permute.xlu1 %960 }
 0x1bc   : > { %v840_v30 = vpop.permute.xlu0 %839 }
 0x1bf   : > { %v1082_v35 = vpop.permute.xlu1 %1081 }
 0x1c0   : > { %v1087_v32 = vpop.permute.xlu0 %1086 }
 0x1c1   : > { %1764 = vmatmul.mubr.msk.bf16.vlgmr.msra.gmra.mrb[4].mxu0 %vm725_vm3, %v840_v30  ;;  %v1092_v34 = vsel %vm725_vm3, %v1087_v32, 0 }
 0x1c2   : > { %1774 = vmatpush3.bf16.xpose.msra.mxu0 %v971_v31  ;;  %1775 = vmatprep.mubr.msk.bf16.mxu0 %vm2137_vm0, %v2136_v0 }
 0x1c3   : > { %1785 = vmatprep.subr.bf16.mxu0 %v2136_v0 }
 0x1c9   : > { %1776 = vmatmul.mubr.msk.bf16.vlgmr.msra.gmra.mrb[8].mxu0 %vm725_vm3, %v961_v33 }
 0x1ca   : > { %1786 = vmatpush3.bf16.xpose.msra.mxu0 %v1092_v34  ;;  %1787 = vmatprep.mubr.msk.bf16.mxu0 %vm2137_vm0, %v2136_v0 }
 0x1cb   : > { %1797 = vmatprep.subr.bf16.mxu0 %v2136_v0 }
 0x1d1   : > { %1788 = vmatmul.mubr.msk.bf16.vlgmr.msra.gmra.mrb[12].mxu0 %vm725_vm3, %v1082_v35 }
 0x1d2   : > { %1801 = vmatprep.mubr.msk.bf16.mxu0 %vm2137_vm0, %v2136_v0 }
 0x21f   : > { %v766_v36 = vpop.f32.mrb[0].mxu0 }
 0x220   : > { %v1753_v37 = vpop.f32.mrb[1].mxu0  ;;  %v772_v38 = vsel %vm725_vm3, %v766_v36, -inf }
 0x221   : > { %773 = vmax.xlane.f32.xlu0 %v772_v38  ;;  %v769_v39 = vpop.f32.mrb[2].mxu0 }
 0x222   : > { %v1754_v40 = vpop.f32.mrb[3].mxu0 }
 0x294   : > { %v886_v41 = vpop.f32.mrb[4].mxu0 }
 0x295   : > { %v1765_v42 = vpop.f32.mrb[5].mxu0  ;;  %v892_v43 = vsel %vm725_vm3, %v886_v41, -inf }
 0x296   : > { %893 = vmax.xlane.f32.xlu1 %v892_v43  ;;  %v889_v44 = vpop.f32.mrb[6].mxu0 }
 0x297   : > { %v1766_v45 = vpop.f32.mrb[7].mxu0 }
 0x29c   : > { %v1007_v46 = vpop.f32.mrb[8].mxu0 }
 0x29d   : > { %v1777_v47 = vpop.f32.mrb[9].mxu0  ;;  %v1013_v48 = vsel %vm725_vm3, %v1007_v46, -inf }
 0x29e   : > { %1014 = vmax.xlane.f32.xlu0 %v1013_v48  ;;  %v1010_v49 = vpop.f32.mrb[10].mxu0 }
 0x29f   : > { %v1778_v50 = vpop.f32.mrb[11].mxu0 }
 0x2a4   : > { %v1128_v51 = vpop.f32.mrb[12].mxu0 }
 0x2a5   : > { %v1789_v52 = vpop.f32.mrb[13].mxu0  ;;  %v1134_v53 = vsel %vm725_vm3, %v1128_v51, -inf }
 0x2a6   : > { %1135 = vmax.xlane.f32.xlu0 %v1134_v53  ;;  %v1131_v54 = vpop.f32.mrb[14].mxu0  ;;  %v1929_v52 = vld [vmem:[#allocation4 + $0x8] sm:$0xff]  }
 0x2a7   : > { %v1790_v55 = vpop.f32.mrb[15].mxu0 }
 0x2ae   : > { %v774_v56 = vpop.xlane.xlu0 %773 }
 0x2af   : > { %v775_v57 = vsub.f32 %v766_v36, %v774_v56 }
 0x2b1   : > { %v776_v58 = vmul.f32 1.442695, %v775_v57 }
 0x2b3   : > { %1936 = vpow2.f32 %v776_v58 }
 0x2bd   : > { %v1937_v59 = vpop.eup %1936 }
 0x2be   : > { %v778_v60 = vsel %vm725_vm3, %v1937_v59, 0.0 }
 0x2bf   : > { %779 = vadd.xlane.f32.xlu1 %v778_v60 }
 0x2d0   : > { %787 = vrot.lane.b32.xlu1 %v1665_v61, %s2141_s26 }
 0x323   : > { %v894_v62 = vpop.xlane.xlu1 %893 }
 0x324   : > { %v895_v63 = vsub.f32 %v886_v41, %v894_v62 }
 0x326   : > { %v896_v1 = vmul.f32 1.442695, %v895_v63 }
 0x328   : > { %1938 = vpow2.f32 %v896_v1 }
 0x32b   : > { %v1015_v2 = vpop.xlane.xlu0 %1014 }
 0x32c   : > { %v1016_v4 = vsub.f32 %v1007_v46, %v1015_v2 }
 0x32e   : > { %v1017_v5 = vmul.f32 1.442695, %v1016_v4  ;;  %v1676_v4 = vld [vmem:[%s2621_s6] ss:$0 sm:$0xff] }
 0x330   : > { %1940 = vpow2.f32 %v1017_v5 }
 0x332   : > { %v1939_v6 = vpop.eup %1938 }
 0x333   : > { %v1136_v7 = vpop.xlane.xlu0 %1135  ;;  %v898_v8 = vsel %vm725_vm3, %v1939_v6, 0.0 }
 0x334   : > { %v1137_v9 = vsub.f32 %v1128_v51, %v1136_v7  ;;  %899 = vadd.xlane.f32.xlu0 %v898_v8  ;;  %v1928_v51 = vld [vmem:[#allocation4] sm:$0xff]  }
 0x335   : > { %1798 = vmatpush3.bf16.msra.mxu0 %v1928_v51 }
 0x336   : > { %v1138_v10 = vmul.f32 1.442695, %v1137_v9  ;;  %1799 = vmatprep.subr.bf16.mxu0 %v2136_v0 }
 0x338   : > { %1942 = vpow2.f32 %v1138_v10 }
 0x339   : > { %1800 = vmatpush3.bf16.msra.mxu0 %v1929_v52 }
 0x33a   : > { %v1941_v11 = vpop.eup %1940  ;;  %1813 = vmatprep.subr.bf16.mxu0 %v2136_v0 }
 0x33b   : > { %v1019_v12 = vsel %vm725_vm3, %v1941_v11, 0.0 }
 0x33c   : > { %1020 = vadd.xlane.f32.xlu1 %v1019_v12 }
 0x342   : > { %v1943_v13 = vpop.eup %1942 }
 0x343   : > { %v1140_v14 = vsel %vm725_vm3, %v1943_v13, 0.0 }
 0x344   : > { %1141 = vadd.xlane.f32.xlu0 %v1140_v14 }
 0x34c   : > { %v780_v15 = vpop.xlane.xlu1 %779 }
 0x34d   : > { %1944 = vrcp.f32 %v780_v15  ;;  %1026 = vrot.lane.b32.xlu1 %v2410_v22, %s2142_s18 }
 0x350   : > { %v788_v16 = vpop.permute.xlu1 %787 }
 0x351   : > { %v794_v17 = vsel %vm792_vm4, %v788_v16, 0  ;;  %1147 = vrot.lane.b32.xlu1 %v2420_v26, %s2143_s15  ;;  %s2665_s15 = sld [smem:[#allocation27_spill]] }
 0x352   : > { %1756 = vmatpush3.bf16.msra.mxu1 %v794_v17  ;;  %v1930_v17 = vld [vmem:[#allocation7] sm:$0xff]  }
 0x353   : > { %1767 = vmatprep.subr.bf16.mxu1 %v2136_v0 }
 0x357   : > { %v1945_v18 = vpop.eup %1944 }
 0x358   : > { %v782_v19 = vmul.f32 %v1945_v18, %v1937_v59  ;;  %v1931_v18 = vld [vmem:[#allocation7 + $0x8] sm:$0xff]  }
 0x35a   : > { %905 = vrot.lane.b32.xlu0 %v2414_v24, %s2144_s23  ;;  %v783_v20 = vpack.c.bf16 %v782_v19, %v782_v19  ;;  %s2532_s23 = scalar_lea.hbm %s2665_s15, %s1696_s20 }
 0x35c   : > { %1758 = vmatmul.mubr.msk.bf16.vlgmr.msra.gmra.mrb[8].mxu1 %vm725_vm3, %v783_v20 }
 0x35d   : > { %1769 = vmatprep.mubr.msk.bf16.mxu1 %vm2137_vm0, %v2136_v0 }
 0x3c1   : > { %v900_v21 = vpop.xlane.xlu0 %899 }
 0x3c2   : > { %1946 = vrcp.f32 %v900_v21 }
 0x3c9   : > { %v1021_v22 = vpop.xlane.xlu1 %1020 }
 0x3ca   : > { %1948 = vrcp.f32 %v1021_v22 }
 0x3cc   : > { %v1947_v23 = vpop.eup %1946 }
 0x3cd   : > { %v902_v26 = vmul.f32 %v1947_v23, %v1939_v6  ;;  %v1027_v24 = vpop.permute.xlu1 %1026 }
 0x3ce   : > { %v1032_v32 = vsel %vm792_vm4, %v1027_v24, 0 }
 0x3cf   : > { %v904_v30 = vpack.c.bf16 %v902_v26, %v902_v26  ;;  %v903_v33 = vadd.f32 %v902_v26, %v782_v19  ;;  %v1933_v19 = vld [vmem:[%s2624_s9 + $0x8] sm:$0xff]  }
 0x3d1   : > { %v1142_v25 = vpop.xlane.xlu0 %1141  ;;  %v1148_v37 = vpop.permute.xlu1 %1147 }
 0x3d2   : > { %1950 = vrcp.f32 %v1142_v25  ;;  %v1153_v41 = vsel %vm792_vm4, %v1148_v37, 0  ;;  %v1680_v25 = vld [vmem:[%s2626_s11] ss:$0 sm:$0xff] }
 0x3d4   : > { %v1949_v28 = vpop.eup %1948 }
 0x3d5   : > { %v906_v27 = vpop.permute.xlu0 %905  ;;  %v1023_v31 = vmul.f32 %v1949_v28, %v1941_v11 }
 0x3d6   : > { %v911_v29 = vsel %vm792_vm4, %v906_v27, 0  ;;  %v1681_v27 = vld [vmem:[%s2627_s12] ss:$0 sm:$0xff] }
 0x3d7   : > { %1768 = vmatpush3.bf16.msra.mxu1 %v911_v29  ;;  %v1024_v35 = vadd.f32 %v1023_v31, %v903_v33  ;;  %v1025_v39 = vpack.c.bf16 %v1023_v31, %v1023_v31  ;;  %v1935_v31 = vld [vmem:[%s2624_s9 + $0x18] sm:$0xff]  }
 0x3d8   : > { %1779 = vmatprep.subr.bf16.mxu1 %v2136_v0 }
 0x3da   : > { %1770 = vmatmul.mubr.msk.bf16.vlgmr.msra.gmra.mrb[12].mxu1 %vm725_vm3, %v904_v30  ;;  %v1934_v30 = vld [vmem:[%s2624_s9 + $0x10] sm:$0xff]  }
 0x3db   : > { %1780 = vmatpush3.bf16.msra.mxu1 %v1032_v32  ;;  %1781 = vmatprep.mubr.msk.bf16.mxu1 %vm2137_vm0, %v2136_v0  ;;  %v1682_v32 = vld [vmem:[%s2623_s8] ss:$0 sm:$0xff] }
 0x3dc   : > { %v1951_v34 = vpop.eup %1950  ;;  %1791 = vmatprep.subr.bf16.mxu1 %v2136_v0 }
 0x3dd   : > { %v1144_v36 = vmul.f32 %v1951_v34, %v1943_v13 }
 0x3df   : > { %v1145_v38 = vadd.f32 %v1144_v36, %v1024_v35  ;;  %v1146_v42 = vpack.c.bf16 %v1144_v36, %v1144_v36 }
 0x3e1   : > { %v1201_v40 = vmul.f32 0.25, %v1145_v38 }
 0x3e2   : > { %1782 = vmatmul.mubr.msk.bf16.vlgmr.msra.gmra.mrb[16].mxu1 %vm725_vm3, %v1025_v39 }
 0x3e3   : > { %1792 = vmatpush3.bf16.msra.mxu1 %v1153_v41  ;;  %1793 = vmatprep.mubr.msk.bf16.mxu1 %vm2137_vm0, %v2136_v0  ;;  %1202 = vst.msk [vmem:[%s2475_s28] sm:$0xff] %vm725_vm3, %v1201_v40 }
 0x3e4   : > { %1805 = vmatprep.subr.bf16.mxu1 %v2136_v0 }
 0x3ea   : > { %1794 = vmatmul.mubr.msk.bf16.vlgmr.msra.gmra.mrb[20].mxu1 %vm725_vm3, %v1146_v42 }
 0x3eb   : > { %1809 = vmatprep.mubr.msk.bf16.mxu1 %vm2137_vm0, %v2136_v0  ;;  %1806 = vmatpush3.bf16.msra.mxu1 %v1930_v17 }
 0x3ec   : > { %1807 = vmatprep.subr.bf16.mxu1 %v2136_v0 }
 0x3ef   : > { %1808 = vmatpush3.bf16.msra.mxu1 %v1931_v18 }
 0x42f   : > { %v830_v43 = vpop.f32.mrb[8].mxu1 }
 0x430   : > { %836 = vst.msk [vmem:[#allocation3] sm:$0xff] %vm725_vm3, %v830_v43  ;;  %v1759_v44 = vpop.f32.mrb[9].mxu1 }
 0x431   : > { %v833_v45 = vpop.f32.mrb[10].mxu1 }
 0x432   : > { %v1760_v46 = vpop.f32.mrb[11].mxu1 }
 0x4ad   : > { %v947_v47 = vpop.f32.mrb[12].mxu1 }
 0x4ae   : > { %954 = vrot.lane.b32.xlu0 %v947_v47, %s2145_s30  ;;  %v1771_v48 = vpop.f32.mrb[13].mxu1  ;;  %s1519_s30 = sshll.u32 %s2475_s28, 4  ;;  %s1520_s30 = int_to_ptr.vmem [resolvable:$true] %s1519_s30 }
 0x4af   : > { %v950_v49 = vpop.f32.mrb[14].mxu1  ;;  %p2019_p2 = scmp.lt.s32.totalorder %s1520_s30, %s2017_s16 }
 0x4b0   : > { %v1772_v50 = vpop.f32.mrb[15].mxu1 }
 0x4b5   : > { %v1068_v53 = vpop.f32.mrb[16].mxu1 }
 0x4b6   : > { %1075 = vrot.lane.b32.xlu1 %v1068_v53, %s2146_s17  ;;  %v1783_v54 = vpop.f32.mrb[17].mxu1  ;;  %s1491_s17 = scalar_lea.sflag [#allocation11], %s2463_s19 }
 0x4b7   : > { %v1071_v55 = vpop.f32.mrb[18].mxu1 }
 0x4b8   : > { %v1784_v56 = vpop.f32.mrb[19].mxu1 }
 0x4bd   : > { %v1189_v57 = vpop.f32.mrb[20].mxu1 }
 0x4be   : > { %1196 = vrot.lane.b32.xlu0 %v1189_v57, %s2147_s13  ;;  %v1795_v58 = vpop.f32.mrb[21].mxu1  ;;  %s2012_s13 = scalar_lea.vmem %s1520_s30, 128 }
 0x4bf   : > { %v1192_v59 = vpop.f32.mrb[22].mxu1  ;;  %p2013_p13 = scmp.ne.s32.totalorder %s1520_s30, %s2012_s13  ;;  %p2020_p3 = scmp.lt.s32.totalorder %s2018_s25, %s2012_s13 }
 0x4c0   : > { %v1796_v60 = vpop.f32.mrb[23].mxu1 }
 0x4c1   : > { %p2014_p10 = pnand %p2013_p13, %p2666_p8  ;;  %p2021_p5 = por %p2020_p3, %p2019_p2 }
 0x4c3   : > { %p2015_p11 = pneg %p2014_p10 }
 0x4c5   : > { %p2022_p6 = pnand %p2021_p5, %p2015_p11 }
 0x520   : > { %v955_v61 = vpop.permute.xlu0 %954 }
 0x521   : > { %958 = vst.msk [vmem:[#allocation3] sm:$0xff] %vm957_vm5, %v955_v61 }
 0x528   : > { %v1076_v62 = vpop.permute.xlu1 %1075 }
 0x529   : > { %1079 = vst.msk [vmem:[#allocation3] sm:$0xff] %vm1078_vm6, %v1076_v62 }
 0x530   : > { %v1197_v63 = vpop.permute.xlu0 %1196 }
 0x531   : > { %1200 = vst.msk [vmem:[#allocation3] sm:$0xff] %vm1199_vm7, %v1197_v63 }
 0x538   : > { %v1203_v1 = vld [vmem:[#allocation3] sm:$0xff] }
 0x539   : > { %v1204_v2 = vpack.c.bf16 %v1203_v1, %v1203_v1 }
 0x53b   : > { %1802 = vmatmul.mubr.msk.bf16.vlgmr.msra.gmra.mrb[16].mxu0 %vm604_vm1, %v1204_v2 }
 0x53c   : > { %1821 = vmatprep.mubr.msk.bf16.mxu0 %vm2137_vm0, %v2136_v0 }
 0x60e   : > { %v1265_v5 = vpop.f32.mrb[16].mxu0 }
 0x60f   : > { %v1266_v6 = vadd.f32 %v1676_v4, %v1265_v5  ;;  %v1803_v7 = vpop.f32.mrb[17].mxu0 }
 0x610   : > { %v1268_v8 = vpop.f32.mrb[18].mxu0 }
 0x611   : > { %v1804_v9 = vpop.f32.mrb[19].mxu0  ;;  %v1271_v10 = vadd.f32 %v1266_v6, %v2382_v3  ;;  %v1932_v3 = vld [vmem:[%s2624_s9] sm:$0xff]  }
 0x612   : > { %1814 = vmatpush3.bf16.msra.mxu0 %v1932_v3 }
 0x613   : > { %v1272_v11 = vsel %vm604_vm1, %v1271_v10, 0.0  ;;  %1815 = vmatprep.subr.bf16.mxu0 %v2136_v0 }
 0x614   : > { %1273 = vadd.xlane.f32.xlu1 %v1272_v11 }
 0x616   : > { %1816 = vmatpush3.bf16.msra.mxu0 %v1933_v19 }
 0x617   : > { %1817 = vmatprep.subr.bf16.mxu0 %v2136_v0 }
 0x61a   : > { %1818 = vmatpush3.bf16.msra.mxu0 %v1934_v30 }
 0x61b   : > { %1819 = vmatprep.subr.bf16.mxu0 %v2136_v0  ;;  %v1686_v0 = vld [vmem:[%s2625_s10] ss:$0 sm:$0xff] }
 0x61e   : > { %1820 = vmatpush3.bf16.msra.mxu0 %v1935_v31 }
 0x6a1   : > { %v1274_v12 = vpop.xlane.xlu1 %1273 }
 0x6a2   : > { %v1276_v13 = vmul.f32 0.03125, %v1274_v12 }
 0x6a4   : > { %v1277_v14 = vsub.f32 %v1271_v10, %v1276_v13 }
 0x6a6   : > { %v1278_v15 = vmul.f32 %v1277_v14, %v1277_v14 }
 0x6a8   : > { %v1279_v16 = vsel %vm604_vm1, %v1278_v15, 0.0 }
 0x6a9   : > { %1280 = vadd.xlane.f32.xlu0 %v1279_v16 }
 0x736   : > { %v1281_v20 = vpop.xlane.xlu0 %1280 }
 0x737   : > { %v1282_v21 = vmul.f32 0.03125, %v1281_v20 }
 0x739   : > { %v1283_v22 = vadd.f32 1e-05, %v1282_v21 }
 0x73b   : > { %1952 = vrsqrt.f32 %v1283_v22 }
 0x745   : > { %v1953_v23 = vpop.eup %1952 }
 0x746   : > { %v1285_v26 = vmul.f32 %v1953_v23, %v1277_v14 }
 0x748   : > { %v1293_v28 = vmul.f32 %v1680_v25, %v1285_v26 }
 0x74a   : > { %v1301_v29 = vadd.f32 %v1681_v27, %v1293_v28 }
 0x74c   : > { %v1302_v24 = vpack.c.bf16 %v1301_v29, %v1301_v29 }
 0x74e   : > { %1810 = vmatmul.mubr.msk.bf16.vlgmr.msra.gmra.mrb[24].mxu1 %vm604_vm1, %v1302_v24 }
 0x821   : > { %v1363_v33 = vpop.f32.mrb[24].mxu1 }
 0x822   : > { %v1364_v34 = vadd.f32 %v1682_v32, %v1363_v33  ;;  %v1811_v35 = vpop.f32.mrb[25].mxu1 }
 0x823   : > { %v1366_v36 = vpop.f32.mrb[26].mxu1 }
 0x824   : > { %v1369_v37 = vmax.f32 %v1364_v34, 0.0  ;;  %v1812_v38 = vpop.f32.mrb[27].mxu1 }
 0x826   : > { %v1370_v39 = vpack.c.bf16 %v1369_v37, %v1369_v37 }
 0x828   : > { %1822 = vmatmul.mubr.msk.bf16.vlgmr.msra.gmra.mrb[20].mxu0 %vm1410_vm8, %v1370_v39 }
 0x8fb   : > { %v1448_v40 = vpop.f32.mrb[20].mxu0 }
 0x8fc   : > { %v1449_v41 = vadd.f32 %v1686_v0, %v1448_v40  ;;  %v1823_v42 = vpop.f32.mrb[21].mxu0 }
 0x8fd   : > { %v1451_v43 = vpop.f32.mrb[22].mxu0 }
 0x8fe   : > { %v1824_v44 = vpop.f32.mrb[23].mxu0  ;;  %v1454_v45 = vadd.f32 %v1449_v41, %v1301_v29 }
 0x900   : > { %v1455_v46 = vsel %vm604_vm1, %v1454_v45, 0.0 }
 0x901   : > { %1456 = vadd.xlane.f32.xlu0 %v1455_v46 }
 0x98e   : > { %v1457_v47 = vpop.xlane.xlu0 %1456 }
 0x98f   : > { %v1458_v48 = vmul.f32 0.03125, %v1457_v47 }
 0x991   : > { %v1459_v49 = vsub.f32 %v1454_v45, %v1458_v48 }
 0x993   : > { %v1460_v50 = vmul.f32 %v1459_v49, %v1459_v49 }
 0x995   : > { %v1461_v51 = vsel %vm604_vm1, %v1460_v50, 0.0 }
 0x996   : > { %1462 = vadd.xlane.f32.xlu1 %v1461_v51 }
 0x997   : > { %2025 = shalt.err (!%p2022_p6)
}
 0x998   : > { %s2026_s28 = scalar_lea.hbm %s2532_s23, 128  ;;  %s2030_s26 = scalar_lea.hbm %s2665_s15, 256 }
 0x999   : > { %p2027_p7 = scmp.ne.s32.totalorder %s2532_s23, %s2026_s28  ;;  %p2031_p0 = scmp.lt.u32.totalorder %s2532_s23, %s2665_s15 }
 0x99a   : > { %p2032_p4 = scmp.lt.u32.totalorder %s2030_s26, %s2026_s28  ;;  %p2034_p13 = scmp.lt.u32.totalorder %s2026_s28, %s2532_s23 }
 0x99b   : > { %p2028_p9 = pnand %p2027_p7, %p2666_p8 }
 0x99c   : > { %p2033_p1 = por %p2032_p4, %p2031_p0 }
 0x99d   : > { %p2029_p12 = pneg %p2028_p9 }
 0x99e   : > { %p2035_p10 = por %p2034_p13, %p2033_p1 }
 0x9a0   : > { %p2036_p11 = pnand %p2035_p10, %p2029_p12 }
 0x9a2   : > { %2039 = shalt.err (!%p2036_p11)
}
 0x9a3   : > { %1834 = dma.vmem_to_hbm [thread:$0]  (%p2666_p8), %s1520_s30, 128, %s2532_s23, %s1491_s17  }
 0x9a4   : > { %s2667_s25 = sld [smem:[#allocation24_spill]]  ;;  %s2668_s21 = sld [smem:[#allocation25_spill]] }
 0x9a5   : > { %s562_s26 = scalar_lea.vmem [#allocation9], %s1653_s27  ;;  %s2669_s17 = sld [smem:[#allocation26_spill]] }
 0x9a6   : > { %s1505_s18 = sshll.u32 %s562_s26, 4  ;;  %s1486_s13 = scalar_lea.sflag [#allocation6], %s2463_s19  ;;  %s2568_s18 = int_to_ptr.vmem [resolvable:$true] %s1505_s18 }
 0x9a7   : > { %s2040_s16 = scalar_lea.vmem %s2568_s18, 128  ;;  %s2149_s27 = smov [#allocation9]  }
 0x9a8   : > { %p2041_p2 = scmp.ne.s32.totalorder %s2568_s18, %s2040_s16  ;;  %s2044_s24 = sshll.u32 %s2149_s27, 4  ;;  %s2045_s24 = int_to_ptr.vmem [resolvable:$false] %s2044_s24 }
 0x9a9   : > { %p2047_p6 = scmp.lt.s32.totalorder %s2568_s18, %s2045_s24 }
 0x9aa   : > { %v1692_v56 = vld [vmem:[%s2667_s25] ss:$0 sm:$0xff]  ;;  %p2042_p3 = pnand %p2041_p2, %p2666_p8  ;;  %s2046_s25 = scalar_lea.vmem %s2045_s24, 256 }
 0x9ab   : > { %v1693_v58 = vld [vmem:[%s2668_s21] ss:$0 sm:$0xff]  ;;  %s2566_s14 = scalar_lea.hbm %s2669_s17, %s1696_s20  ;;  %p2048_p7 = scmp.lt.s32.totalorder %s2046_s25, %s2040_s16 }
 0x9ac   : > { %p2043_p5 = pneg %p2042_p3 }
 0x9ad   : > { %p2049_p9 = por %p2048_p7, %p2047_p6 }
 0x9af   : > { %p2050_p12 = pnand %p2049_p9, %p2043_p5 }
 0xa23   : > { %v1463_v52 = vpop.xlane.xlu1 %1462 }
 0xa24   : > { %v1464_v53 = vmul.f32 0.03125, %v1463_v52 }
 0xa26   : > { %v1465_v54 = vadd.f32 1e-05, %v1464_v53 }
 0xa28   : > { %1954 = vrsqrt.f32 %v1465_v54 }
 0xa32   : > { %v1955_v55 = vpop.eup %1954 }
 0xa33   : > { %v1467_v57 = vmul.f32 %v1955_v55, %v1459_v49 }
 0xa35   : > { %v1475_v59 = vmul.f32 %v1692_v56, %v1467_v57 }
 0xa37   : > { %v1483_v60 = vadd.f32 %v1693_v58, %v1475_v59 }
 0xa39   : > { %1484 = vst.msk [vmem:[%s562_s26] sm:$0xff] %vm604_vm1, %v1483_v60 }
 0xa3a   : > { %2053 = shalt.err (!%p2050_p12)
}
 0xa3b   : > { %s2054_s19 = scalar_lea.hbm %s2566_s14, 128  ;;  %s2058_s29 = scalar_lea.hbm %s2669_s17, 256 }
 0xa3c   : > { %p2055_p0 = scmp.ne.s32.totalorder %s2566_s14, %s2054_s19  ;;  %p2059_p13 = scmp.lt.u32.totalorder %s2566_s14, %s2669_s17 }
 0xa3d   : > { %p2060_p10 = scmp.lt.u32.totalorder %s2058_s29, %s2054_s19  ;;  %p2062_p2 = scmp.lt.u32.totalorder %s2054_s19, %s2566_s14 }
 0xa3e   : > { %p2056_p4 = pnand %p2055_p0, %p2666_p8 }
 0xa3f   : > { %p2061_p11 = por %p2060_p10, %p2059_p13 }
 0xa40   : > { %p2057_p1 = pneg %p2056_p4 }
 0xa41   : > { %p2063_p3 = por %p2062_p2, %p2061_p11 }
 0xa43   : > { %p2064_p5 = pnand %p2063_p3, %p2057_p1 }
 0xa45   : > { %2067 = shalt.err (!%p2064_p5)
}
 0xa46   : > { %1833 = dma.vmem_to_hbm [thread:$0]  (%p2666_p8), %s2568_s18, 128, %s2566_s14, %s1486_s13  }
 0xa47 PF: > { %s2670_s23 = sld [smem:[#allocation19_spill]]  ;;  %s2671_s30 = sld [smem:[#allocation16_spill]] }
 0xa48   : > { %s2672_s16 = sld [smem:[#allocation21_spill]] }
 0xa4d   : > { %p1855_p6 = scmp.ge.s32.totalorder %s2670_s23, 2  ;;  %s1531_s27 = sand.u32 1, %s2671_s30  }
 0xa4e   : > { %p2673_p7 = scmp.ne.s32.totalorder %s2672_s16, 0  ;;  %s1532_s24 = scalar_lea.sflag [#allocation6], %s1531_s27 }
 0xa50   : > { %p1845_p9 = pnand %p1855_p6, %p2673_p7 }
 0xa52   : > { %2101 = dma.done.wait (!%p1845_p9), %s1532_s24, 128  }
 0xa53   : > { %2103 = vsyncadd (!%p1845_p9), %s1532_s24, 4294967168  ;;  %s1541_s25 = scalar_lea.sflag [#allocation11], %s1531_s27 }
 0xa54   : > { %2105 = dma.done.wait (!%p1845_p9), %s1541_s25, 128  }
 0xa55   : > { %2107 = vsyncadd (!%p1845_p9), %s1541_s25, 4294967168  ;;  %s35_s26 = sadd.s32 1, %s2670_s23   ;;  %s2674_s0 = sld [smem:[#allocation17_spill]] }
 0xa56   : > { %p32_p12 = scmp.ge.s32.totalorder %s35_s26, 4   ;;  %s2675_s23 = sld [smem:[#allocation22_spill]] }
 0xa57   : > { %s2676_s24 = sld [smem:[#allocation18_spill]]  ;;  %s2677_s25 = sld [smem:[#allocation20_spill]] }
 0xa58   : > { %s2678_s21 = smov %s2114_s22  ;;  %34 = sbr.rel (!%p32_p12) target bundleno = 14 (0xe), region = 146 }
 0xa5b   : > { %s2679_s22 = smov %s2674_s0 }
 0xa5f   :  { %1546 = vsyncpa [#allocation5], 1 }
 0xa60   :  { %1548 = vsyncpa [#allocation5 + $0x1], 1 }
 0xa61   :  { %1549 = vsyncpa [#allocation8], 1 }
 0xa62   :  { %1550 = vsyncpa [#allocation6], 1 }
 0xa63   :  { %1552 = vsyncpa [#allocation6 + $0x1], 1 }
 0xa64   :  { %1553 = vsyncpa [#allocation11], 1 }
 0xa65   :  { %1555 = vsyncpa [#allocation11 + $0x1], 1 }

// kernel: tpu_custom_call.1
= control target key start
LH: loop header
LB: loop body
LE: loop exit
PB: predicated region body
PF: predicated region fallthrough
CT: control target
= control target key end

     0   :  { %s2615_s0 = inlined_call_operand.vmem [shape: f32[2,8,32], index: 0, kind: input, shape index: {}]   ;;  %s2616_s1 = inlined_call_operand.vmem [shape: bf16[32,32], index: 1, kind: input, shape index: {}]   ;;  %s2617_s2 = inlined_call_operand.vmem [shape: f32[1,32], index: 2, kind: input, shape index: {}]   ;;  %s2618_s3 = inlined_call_operand.vmem [shape: bf16[32,64], index: 3, kind: input, shape index: {}]   ;;  %s2619_s4 = inlined_call_operand.vmem [shape: f32[1,64], index: 4, kind: input, shape index: {}]   ;;  %s2620_s5 = inlined_call_operand.hbm [shape: bf16[32,32], index: 5, kind: input, shape index: {}]   ;;  %s2621_s6 = inlined_call_operand.vmem [shape: f32[1,32], index: 6, kind: input, shape index: {}]   ;;  %s2622_s7 = inlined_call_operand.hbm [shape: bf16[32,64], index: 7, kind: input, shape index: {}]   ;;  %s2623_s8 = inlined_call_operand.vmem [shape: f32[1,64], index: 8, kind: input, shape index: {}]   ;;  %s2624_s9 = inlined_call_operand.vmem [shape: bf16[64,32], index: 9, kind: input, shape index: {}]   ;;  %s2625_s10 = inlined_call_operand.vmem [shape: f32[1,32], index: 10, kind: input, shape index: {}]   ;;  %s2626_s11 = inlined_call_operand.vmem [shape: f32[1,32], index: 11, kind: input, shape index: {}]   ;;  %s2627_s12 = inlined_call_operand.vmem [shape: f32[1,32], index: 12, kind: input, shape index: {}]   ;;  %s2628_s13 = inlined_call_operand.vmem [shape: f32[1,32], index: 13, kind: input, shape index: {}]   ;;  %s2629_s14 = inlined_call_operand.vmem [shape: f32[1,32], index: 14, kind: input, shape index: {}]   ;;  %s2630_s15 = inlined_call_operand.hbm [shape: f32[2,8,32], index: 15, kind: output, shape index: {0}]   ;;  %s2631_s16 = inlined_call_operand.hbm [shape: f32[2,8,8], index: 16, kind: output, shape index: {1}]  }
   0x1   :  { %2645 = sst [smem:[#allocation23_spill]] %s2615_s0 }
   0x2   :  { %2646 = sst [smem:[#allocation24_spill]] %s2628_s13 }
   0x3   :  { %2647 = sst [smem:[#allocation25_spill]] %s2629_s14 }
   0x4   :  { %2648 = sst [smem:[#allocation26_spill]] %s2630_s15 }
   0x5   :  { %2649 = sst [smem:[#allocation27_spill]] %s2631_s16 }
   0x6   :  { %22 = vsyncpa [#allocation5], 0 }
   0x7   :  { %23 = vsyncpa [#allocation8], 0 }
   0x8   :  { %24 = vsyncpa [#allocation6], 0 }
   0x9   :  { %26 = vsyncpa [#allocation6 + $0x1], 0 }
   0xa   :  { %27 = vsyncpa [#allocation11], 0 }
   0xb   :  { %29 = vsyncpa [#allocation11 + $0x1], 0  ;;  %s2235_s21 = smov 0   ;;  %s2237_s22 = smov 0  }
   0xc   :  { %s2239_s23 = smov 0   ;;  %s2241_s24 = smov 0  }
   0xd   :  { %s2243_s25 = smov 0   ;;  %s2245_s26 = smov 0  }
   0xe LB: > { %2650 = sst [smem:[#allocation16_spill]] %s2110_s21  ;;  %s1644_s27 = sadd.s32 4294967295, %s2130_s26   ;;  %s2130_s26 = sphi %s2245_s26, %s35_s26   ;;  %s2126_s25 = sphi %s2243_s25, %s2677_s25   ;;  %s2122_s24 = sphi %s2241_s24, %s2676_s24   ;;  %s2118_s23 = sphi %s2239_s23, %s2675_s23   ;;  %s2114_s22 = sphi %s2237_s22, %s2679_s22   ;;  %s2110_s21 = sphi %s2235_s21, %s2678_s21  }
   0xf   : > { %2651 = sst [smem:[#allocation17_spill]] %s2118_s23  ;;  %s1645_s28 = sadd.s32 4294967294, %s2130_s26  }
  0x10   : > { %2652 = sst [smem:[#allocation18_spill]] %s2126_s25  ;;  %s47_s29 = sadd.s32 1, %s2126_s25 }
  0x11   : > { %2653 = sst [smem:[#allocation19_spill]] %s2130_s26  ;;  %s376_s30 = sadd.s32 1, %s2118_s23 }
  0x12   : > { %p49_p0 = scmp.ge.s32.totalorder %s47_s29, 2  ;;  %p386_p1 = scmp.ne.s32.totalorder %s2118_s23, %s2114_s22 }
  0x13   : > { %p387_p2 = scmp.eq.s32.totalorder %s1644_s27, 1  ;;  %p392_p3 = scmp.ne.s32.totalorder %s2114_s22, %s2110_s21 }
  0x14   : > { %s2681_s29 = smov (%p49_p0, %s47_s29), 0  ;;  %p393_p5 = scmp.eq.s32.totalorder %s1645_s28, 1 }
  0x15   : > { %2654 = sst [smem:[#allocation20_spill]] %s2681_s29  ;;  %p2275_p4 = por %p387_p2, %p386_p1 }
  0x16   : > { %s371_s17 = ssub.s32 %s2126_s25, %s2681_s29  ;;  %p1646_p6 = scmp.ge.s32.totalorder %s2130_s26, 1 }
  0x17   : > { %s2655_s0 = scalar_select %p2275_p4, 1, 0 }
  0x18   : > { %p374_p7 = scmp.eq.s32.totalorder %s371_s17, 0  ;;  %p2282_p8 = por %p393_p5, %p392_p3 }
  0x19   : > { %p428_p9 = scmp.lt.s32.totalorder %s2130_s26, 3  ;;  %p2294_p11 = scmp.eq.s32.totalorder %s1644_s27, 0 }
  0x1a   : > { %s2656_s18 = scalar_select %p2282_p8, 1, 0 }
  0x1b   : > { %s2288_s19 = scalar_select %p374_p7, %s2118_s23, %s376_s30  }
  0x1c   : > { %2657 = sst [smem:[#allocation21_spill]] %s2656_s18  ;;  %p2290_p10 = pnand %p1646_p6, %p428_p9 }
  0x1d   : > { %2658 = sst [smem:[#allocation22_spill]] %s2288_s19  ;;  %s2132_s28 = smov [#allocation4]  }
  0x1e   : > { %s2659_s20 = scalar_select %p2290_p10, 1, 0 }
  0x1f   : > { %s2660_s21 = scalar_select %p2294_p11, 1, 0 }
  0x20   : > { %p1837_p12 = pneg %p2290_p10  ;;  %s452_s17 = sshll.u32 %s2132_s28, 4  ;;  %s453_s17 = int_to_ptr.vmem [resolvable:$true] %s452_s17 }
  0x21   : > { %s2133_s30 = smov [#allocation7]   ;;  %s1956_s23 = scalar_lea.hbm %s2620_s5, 256 }
  0x22   : > { %p2302_p13 = pnand %p2294_p11, %p1837_p12  ;;  %s468_s25 = sshll.u32 %s2133_s30, 4  ;;  %s2306_s25 = int_to_ptr.vmem [resolvable:$true] %s468_s25 }
  0x23   : > { %p1957_p0 = scmp.ne.s32.totalorder %s2620_s5, %s1956_s23  ;;  %p1963_p5 = scmp.lt.u32.totalorder %s1956_s23, %s2620_s5 }
  0x24   : > { %p1958_p1 = pneg %p2302_p13 }
  0x26   : > { %p1959_p2 = pnand %p1958_p1, %p1957_p0 }
  0x28   : > { %p1960_p3 = pneg %p1959_p2 }
  0x2a   : > { %p1965_p6 = pnand %p1963_p5, %p1960_p3 }
  0x2c   : > { %1968 = shalt.err (!%p1965_p6)
}
  0x2d   : > { %s1969_s30 = scalar_lea.vmem %s453_s17, 256  ;;  %p1977_p8 = scmp.lt.s32.totalorder %s453_s17, %s453_s17 }
  0x2e   : > { %p1970_p7 = scmp.ne.s32.totalorder %s453_s17, %s1969_s30  ;;  %p1978_p4 = scmp.lt.s32.totalorder %s1969_s30, %s1969_s30 }
  0x30   : > { %p1972_p9 = pnand %p1970_p7, %p1958_p1  ;;  %p1979_p11 = por %p1978_p4, %p1977_p8 }
  0x32   : > { %p1973_p12 = pneg %p1972_p9 }
  0x34   : > { %p1980_p10 = pnand %p1979_p11, %p1973_p12 }
  0x36   : > { %1983 = shalt.err (!%p1980_p10)
}
  0x37   : > { %s2134_s26 = smov 64   ;;  %s2135_s18 = smov 4  }
  0x38   : > { %1840 = dma.hbm_to_vmem [thread:$0]  (!%p2302_p13), %s2620_s5, 256, %s453_s17, [#allocation5], %s2134_s26, %s2134_s26, %s2135_s18  }
  0x39   : > { %s1984_s28 = scalar_lea.hbm %s2622_s7, 256 }
  0x3a   : > { %p1985_p0 = scmp.ne.s32.totalorder %s2622_s7, %s1984_s28  ;;  %p1991_p10 = scmp.lt.u32.totalorder %s1984_s28, %s2622_s7 }
  0x3c   : > { %p1987_p4 = pnand %p1985_p0, %p1958_p1 }
  0x3e   : > { %p1988_p8 = pneg %p1987_p4 }
  0x40   : > { %p1993_p11 = pnand %p1991_p10, %p1988_p8 }
  0x42   : > { %1996 = shalt.err (!%p1993_p11)
}
  0x43   : > { %s1997_s17 = scalar_lea.vmem %s2306_s25, 256  ;;  %p2005_p6 = scmp.lt.s32.totalorder %s2306_s25, %s2306_s25 }
  0x44   : > { %p1998_p2 = scmp.ne.s32.totalorder %s2306_s25, %s1997_s17  ;;  %p2006_p7 = scmp.lt.s32.totalorder %s1997_s17, %s1997_s17 }
  0x46   : > { %p2000_p3 = pnand %p1998_p2, %p1958_p1  ;;  %p2007_p9 = por %p2006_p7, %p2005_p6 }
  0x48   : > { %p2001_p5 = pneg %p2000_p3 }
  0x4a   : > { %p2008_p12 = pnand %p2007_p9, %p2001_p5 }
  0x4c   : > { %2011 = shalt.err (!%p2008_p12)
}
  0x4d   : > { %1843 = dma.hbm_to_vmem [thread:$0]  (!%p2302_p13), %s2622_s7, 256, %s2306_s25, [#allocation8], %s2134_s26, %s2134_s26, %s2135_s18  }
  0x4e   : > { %p2662_p0 = scmp.ne.s32.totalorder %s2659_s20, 0 }
  0x4f   : > { %p2663_p4 = scmp.ne.s32.totalorder (!%p2662_p0), %s2660_s21, 0 }
  0x50   : > { %512 = sbr.rel (%p2662_p0) target bundleno = 2631 (0xa47), region = 80 }
  0x57   : > { %2093 = dma.done.wait (%p2663_p4), [#allocation5], 256  }
  0x58   : > { %2095 = vsyncadd (%p2663_p4), [#allocation5], 4294967040 }
  0x59   : > { %2097 = dma.done.wait (%p2663_p4), [#allocation8], 256  }
  0x5a   : > { %2099 = vsyncadd (%p2663_p4), [#allocation8], 4294967040  ;;  %p570_p1 = scmp.lt.s32.totalorder %s2122_s24, 1  ;;  %v2136_v0 = vmov 0.0   ;;  %vm2137_vm0 = vmmov 0   ;;  %s2664_s20 = sld [smem:[#allocation23_spill]] }
  0x5b   : > { %1733 = vmatprep.subr.bf16.mxu1 %v2136_v0  ;;  %1737 = vmatprep.mubr.msk.bf16.mxu1 %vm2137_vm0, %v2136_v0  ;;  %v1920_v1 = vld [vmem:[%s2618_s3] sm:$0xff]   ;;  %v1921_v2 = vld [vmem:[%s2618_s3 + $0x8] sm:$0xff]   ;;  %vm604_vm1 = vcmask 261120   ;;  %vm649_vm2 = vcmask 519168   ;;  %vm725_vm3 = vcmask 64512   ;;  %s2138_s29 = smov 112  }
  0x5c   : > { %s571_s16 = scalar_select %p570_p1, %s2122_s24, 1  ;;  %1749 = vmatprep.subr.bf16.mxu0 %v2136_v0  ;;  %1751 = vmatprep.mubr.msk.bf16.mxu0 %vm2137_vm0, %v2136_v0  ;;  %v1922_v4 = vld [vmem:[%s2616_s1] sm:$0xff]   ;;  %v1923_v6 = vld [vmem:[%s2616_s1 + $0x8] sm:$0xff]   ;;  %vm792_vm4 = vcmask 1043456   ;;  %vm957_vm5 = vcmask 130112   ;;  %vm1078_vm6 = vcmask 195712  }
  0x5d   : > { %1734 = vmatpush3.bf16.msra.mxu1 %v1920_v1  ;;  %v1656_v7 = vld [vmem:[%s2619_s4] ss:$0 sm:$0xff]  ;;  %s2139_s21 = smov 120   ;;  %s2142_s18 = smov 80   ;;  %vm1199_vm7 = vcmask 261312   ;;  %vm1410_vm8 = vcmask 523264  }
  0x5e   : > { %s1655_s25 = sshll.u32 %s571_s16, 3  ;;  %1735 = vmatprep.subr.bf16.mxu1 %v2136_v0  ;;  %v1660_v14 = vld [vmem:[%s2617_s2] ss:$0 sm:$0xff]  ;;  %s2143_s15 = smov 72  }
  0x5f   : > { %s2144_s23 = smov 88   ;;  %s2463_s19 = sand.u32 1, %s2114_s22  }
  0x60   : > { %s573_s26 = scalar_lea.vmem %s2664_s20, %s1655_s25  ;;  %s2140_s20 = smov 104  }
  0x61   : > { %v2382_v3 = vld [vmem:[%s573_s26] sm:$0xff]  ;;  %1736 = vmatpush3.bf16.msra.mxu1 %v1921_v2  ;;  %s2141_s26 = smov 96   ;;  %s1653_s27 = sshll.u32 %s2463_s19, 3 }
  0x62   : > { %v580_v5 = vpack.c.bf16 %v2382_v3, %v2382_v3  ;;  %1741 = vmatprep.subr.bf16.mxu1 %v2136_v0  ;;  %s2475_s28 = scalar_lea.vmem [#allocation10], %s1653_s27  ;;  %s2145_s30 = smov 8  }
  0x63   : > { %s2146_s17 = smov 16   ;;  %s2147_s13 = smov 24  }
  0x64   : > { %1738 = vmatmul.mubr.msk.bf16.vlgmr.msra.gmra.mrb[0].mxu1 %vm604_vm1, %v580_v5  ;;  %p2666_p8 = scmp.ne.s32.totalorder %s2655_s0, 0  ;;  %s2148_s14 = smov [#allocation10]  }
  0x65   : > { %1742 = vmatpush3.bf16.msra.mxu1 %v1922_v4  ;;  %1745 = vmatprep.mubr.msk.bf16.mxu1 %vm2137_vm0, %v2136_v0  ;;  %s2016_s16 = sshll.u32 %s2148_s14, 4  ;;  %s2017_s16 = int_to_ptr.vmem [resolvable:$false] %s2016_s16 }
  0x66   : > { %1743 = vmatprep.subr.bf16.mxu1 %v2136_v0  ;;  %s2018_s25 = scalar_lea.vmem %s2017_s16, 256 }
  0x69   : > { %1744 = vmatpush3.bf16.msra.mxu1 %v1923_v6 }
  0x6a   : > { %1755 = vmatprep.subr.bf16.mxu1 %v2136_v0 }
  0x6c   : > { %1746 = vmatmul.mubr.msk.bf16.vlgmr.msra.gmra.mrb[4].mxu1 %vm604_vm1, %v580_v5 }
  0x6d   : > { %1757 = vmatprep.mubr.msk.bf16.mxu1 %vm2137_vm0, %v2136_v0 }
 0x137   : > { %v642_v8 = vpop.f32.mrb[0].mxu1 }
 0x138   : > { %v643_v9 = vadd.f32 %v1656_v7, %v642_v8  ;;  %v1739_v10 = vpop.f32.mrb[1].mxu1 }
 0x139   : > { %v645_v11 = vpop.f32.mrb[2].mxu1 }
 0x13a   : > { %v648_v12 = vpack.c.bf16 %v643_v9, %v643_v9  ;;  %v1740_v13 = vpop.f32.mrb[3].mxu1 }
 0x13c   : > { %650 = vst.msk [vmem:[#allocation2] sm:$0xf] %vm649_vm2, %v648_v12 }
 0x13f   : > { %v716_v15 = vpop.f32.mrb[4].mxu1 }
 0x140   : > { %v717_v16 = vadd.f32 %v1660_v14, %v716_v15  ;;  %v1747_v17 = vpop.f32.mrb[5].mxu1 }
 0x141   : > { %v719_v18 = vpop.f32.mrb[6].mxu1 }
 0x142   : > { %v722_v19 = vmul.f32 0.35355338, %v717_v16  ;;  %v1748_v20 = vpop.f32.mrb[7].mxu1 }
 0x143   : > { %v2408_v21 = vld [vmem:[#allocation2] sm:$0xf] }
 0x144   : > { %v2410_v22 = vld [vmem:[#allocation2] ss:$0 sps:$4 sm:$0xff]   ;;  %v730_v23 = vsel %vm725_vm3, %v2408_v21, 0  ;;  %v723_v25 = vpack.c.bf16 %v722_v19, %v722_v19  ;;  %v1665_v61 = vcombine.low %v2408_v21, %v2408_v21 }
 0x145   : > { %v2414_v24 = vld [vmem:[#allocation2] ss:$0 sps:$4 sm:$0xff]   ;;  %1750 = vmatpush3.bf16.xpose.msra.mxu0 %v730_v23  ;;  %965 = vrot.lane.b32.xlu1 %v2410_v22, %s2138_s29 }
 0x146   : > { %844 = vrot.lane.b32.xlu0 %v2414_v24, %s2139_s21  ;;  %1761 = vmatprep.subr.bf16.mxu0 %v2136_v0  ;;  %v2420_v26 = vld [vmem:[#allocation2] ss:$0 sps:$4 sm:$0xff]  }
 0x149   : > { %960 = vrot.lane.b32.xlu1 %v723_v25, %s2138_s29 }
 0x14a   : > { %839 = vrot.lane.b32.xlu0 %v723_v25, %s2139_s21 }
 0x14c   : > { %1752 = vmatmul.mubr.msk.bf16.vlgmr.msra.gmra.mrb[0].mxu0 %vm725_vm3, %v723_v25 }
 0x14d   : > { %1081 = vrot.lane.b32.xlu1 %v723_v25, %s2140_s20  ;;  %1763 = vmatprep.mubr.msk.bf16.mxu0 %vm2137_vm0, %v2136_v0 }
 0x14e   : > { %1086 = vrot.lane.b32.xlu0 %v2420_v26, %s2140_s20  ;;  %s1696_s20 = sshll.u32 %s2122_s24, 7 }
 0x1b7   : > { %v966_v29 = vpop.permute.xlu1 %965 }
 0x1b8   : > { %v845_v27 = vpop.permute.xlu0 %844  ;;  %v971_v31 = vsel %vm725_vm3, %v966_v29, 0 }
 0x1b9   : > { %v850_v28 = vsel %vm725_vm3, %v845_v27, 0 }
 0x1ba   : > { %1762 = vmatpush3.bf16.xpose.msra.mxu0 %v850_v28 }
 0x1bb   : > { %1773 = vmatprep.subr.bf16.mxu0 %v2136_v0  ;;  %v961_v33 = vpop.permute.xlu1 %960 }
 0x1bc   : > { %v840_v30 = vpop.permute.xlu0 %839 }
 0x1bf   : > { %v1082_v35 = vpop.permute.xlu1 %1081 }
 0x1c0   : > { %v1087_v32 = vpop.permute.xlu0 %1086 }
 0x1c1   : > { %1764 = vmatmul.mubr.msk.bf16.vlgmr.msra.gmra.mrb[4].mxu0 %vm725_vm3, %v840_v30  ;;  %v1092_v34 = vsel %vm725_vm3, %v1087_v32, 0 }
 0x1c2   : > { %1774 = vmatpush3.bf16.xpose.msra.mxu0 %v971_v31  ;;  %1775 = vmatprep.mubr.msk.bf16.mxu0 %vm2137_vm0, %v2136_v0 }
 0x1c3   : > { %1785 = vmatprep.subr.bf16.mxu0 %v2136_v0 }
 0x1c9   : > { %1776 = vmatmul.mubr.msk.bf16.vlgmr.msra.gmra.mrb[8].mxu0 %vm725_vm3, %v961_v33 }
 0x1ca   : > { %1786 = vmatpush3.bf16.xpose.msra.mxu0 %v1092_v34  ;;  %1787 = vmatprep.mubr.msk.bf16.mxu0 %vm2137_vm0, %v2136_v0 }
 0x1cb   : > { %1797 = vmatprep.subr.bf16.mxu0 %v2136_v0 }
 0x1d1   : > { %1788 = vmatmul.mubr.msk.bf16.vlgmr.msra.gmra.mrb[12].mxu0 %vm725_vm3, %v1082_v35 }
 0x1d2   : > { %1801 = vmatprep.mubr.msk.bf16.mxu0 %vm2137_vm0, %v2136_v0 }
 0x21f   : > { %v766_v36 = vpop.f32.mrb[0].mxu0 }
 0x220   : > { %v1753_v37 = vpop.f32.mrb[1].mxu0  ;;  %v772_v38 = vsel %vm725_vm3, %v766_v36, -inf }
 0x221   : > { %773 = vmax.xlane.f32.xlu0 %v772_v38  ;;  %v769_v39 = vpop.f32.mrb[2].mxu0 }
 0x222   : > { %v1754_v40 = vpop.f32.mrb[3].mxu0 }
 0x294   : > { %v886_v41 = vpop.f32.mrb[4].mxu0 }
 0x295   : > { %v1765_v42 = vpop.f32.mrb[5].mxu0  ;;  %v892_v43 = vsel %vm725_vm3, %v886_v41, -inf }
 0x296   : > { %893 = vmax.xlane.f32.xlu1 %v892_v43  ;;  %v889_v44 = vpop.f32.mrb[6].mxu0 }
 0x297   : > { %v1766_v45 = vpop.f32.mrb[7].mxu0 }
 0x29c   : > { %v1007_v46 = vpop.f32.mrb[8].mxu0 }
 0x29d   : > { %v1777_v47 = vpop.f32.mrb[9].mxu0  ;;  %v1013_v48 = vsel %vm725_vm3, %v1007_v46, -inf }
 0x29e   : > { %1014 = vmax.xlane.f32.xlu0 %v1013_v48  ;;  %v1010_v49 = vpop.f32.mrb[10].mxu0 }
 0x29f   : > { %v1778_v50 = vpop.f32.mrb[11].mxu0 }
 0x2a4   : > { %v1128_v51 = vpop.f32.mrb[12].mxu0 }
 0x2a5   : > { %v1789_v52 = vpop.f32.mrb[13].mxu0  ;;  %v1134_v53 = vsel %vm725_vm3, %v1128_v51, -inf }
 0x2a6   : > { %1135 = vmax.xlane.f32.xlu0 %v1134_v53  ;;  %v1131_v54 = vpop.f32.mrb[14].mxu0  ;;  %v1929_v52 = vld [vmem:[#allocation4 + $0x8] sm:$0xff]  }
 0x2a7   : > { %v1790_v55 = vpop.f32.mrb[15].mxu0 }
 0x2ae   : > { %v774_v56 = vpop.xlane.xlu0 %773 }
 0x2af   : > { %v775_v57 = vsub.f32 %v766_v36, %v774_v56 }
 0x2b1   : > { %v776_v58 = vmul.f32 1.442695, %v775_v57 }
 0x2b3   : > { %1936 = vpow2.f32 %v776_v58 }
 0x2bd   : > { %v1937_v59 = vpop.eup %1936 }
 0x2be   : > { %v778_v60 = vsel %vm725_vm3, %v1937_v59, 0.0 }
 0x2bf   : > { %779 = vadd.xlane.f32.xlu1 %v778_v60 }
 0x2d0   : > { %787 = vrot.lane.b32.xlu1 %v1665_v61, %s2141_s26 }
 0x323   : > { %v894_v62 = vpop.xlane.xlu1 %893 }
 0x324   : > { %v895_v63 = vsub.f32 %v886_v41, %v894_v62 }
 0x326   : > { %v896_v1 = vmul.f32 1.442695, %v895_v63 }
 0x328   : > { %1938 = vpow2.f32 %v896_v1 }
 0x32b   : > { %v1015_v2 = vpop.xlane.xlu0 %1014 }
 0x32c   : > { %v1016_v4 = vsub.f32 %v1007_v46, %v1015_v2 }
 0x32e   : > { %v1017_v5 = vmul.f32 1.442695, %v1016_v4  ;;  %v1676_v4 = vld [vmem:[%s2621_s6] ss:$0 sm:$0xff] }
 0x330   : > { %1940 = vpow2.f32 %v1017_v5 }
 0x332   : > { %v1939_v6 = vpop.eup %1938 }
 0x333   : > { %v1136_v7 = vpop.xlane.xlu0 %1135  ;;  %v898_v8 = vsel %vm725_vm3, %v1939_v6, 0.0 }
 0x334   : > { %v1137_v9 = vsub.f32 %v1128_v51, %v1136_v7  ;;  %899 = vadd.xlane.f32.xlu0 %v898_v8  ;;  %v1928_v51 = vld [vmem:[#allocation4] sm:$0xff]  }
 0x335   : > { %1798 = vmatpush3.bf16.msra.mxu0 %v1928_v51 }
 0x336   : > { %v1138_v10 = vmul.f32 1.442695, %v1137_v9  ;;  %1799 = vmatprep.subr.bf16.mxu0 %v2136_v0 }
 0x338   : > { %1942 = vpow2.f32 %v1138_v10 }
 0x339   : > { %1800 = vmatpush3.bf16.msra.mxu0 %v1929_v52 }
 0x33a   : > { %v1941_v11 = vpop.eup %1940  ;;  %1813 = vmatprep.subr.bf16.mxu0 %v2136_v0 }
 0x33b   : > { %v1019_v12 = vsel %vm725_vm3, %v1941_v11, 0.0 }
 0x33c   : > { %1020 = vadd.xlane.f32.xlu1 %v1019_v12 }
 0x342   : > { %v1943_v13 = vpop.eup %1942 }
 0x343   : > { %v1140_v14 = vsel %vm725_vm3, %v1943_v13, 0.0 }
 0x344   : > { %1141 = vadd.xlane.f32.xlu0 %v1140_v14 }
 0x34c   : > { %v780_v15 = vpop.xlane.xlu1 %779 }
 0x34d   : > { %1944 = vrcp.f32 %v780_v15  ;;  %1026 = vrot.lane.b32.xlu1 %v2410_v22, %s2142_s18 }
 0x350   : > { %v788_v16 = vpop.permute.xlu1 %787 }
 0x351   : > { %v794_v17 = vsel %vm792_vm4, %v788_v16, 0  ;;  %1147 = vrot.lane.b32.xlu1 %v2420_v26, %s2143_s15  ;;  %s2665_s15 = sld [smem:[#allocation27_spill]] }
 0x352   : > { %1756 = vmatpush3.bf16.msra.mxu1 %v794_v17  ;;  %v1930_v17 = vld [vmem:[#allocation7] sm:$0xff]  }
 0x353   : > { %1767 = vmatprep.subr.bf16.mxu1 %v2136_v0 }
 0x357   : > { %v1945_v18 = vpop.eup %1944 }
 0x358   : > { %v782_v19 = vmul.f32 %v1945_v18, %v1937_v59  ;;  %v1931_v18 = vld [vmem:[#allocation7 + $0x8] sm:$0xff]  }
 0x35a   : > { %905 = vrot.lane.b32.xlu0 %v2414_v24, %s2144_s23  ;;  %v783_v20 = vpack.c.bf16 %v782_v19, %v782_v19  ;;  %s2532_s23 = scalar_lea.hbm %s2665_s15, %s1696_s20 }
 0x35c   : > { %1758 = vmatmul.mubr.msk.bf16.vlgmr.msra.gmra.mrb[8].mxu1 %vm725_vm3, %v783_v20 }
 0x35d   : > { %1769 = vmatprep.mubr.msk.bf16.mxu1 %vm2137_vm0, %v2136_v0 }
 0x3c1   : > { %v900_v21 = vpop.xlane.xlu0 %899 }
 0x3c2   : > { %1946 = vrcp.f32 %v900_v21 }
 0x3c9   : > { %v1021_v22 = vpop.xlane.xlu1 %1020 }
 0x3ca   : > { %1948 = vrcp.f32 %v1021_v22 }
 0x3cc   : > { %v1947_v23 = vpop.eup %1946 }
 0x3cd   : > { %v902_v26 = vmul.f32 %v1947_v23, %v1939_v6  ;;  %v1027_v24 = vpop.permute.xlu1 %1026 }
 0x3ce   : > { %v1032_v32 = vsel %vm792_vm4, %v1027_v24, 0 }
 0x3cf   : > { %v904_v30 = vpack.c.bf16 %v902_v26, %v902_v26  ;;  %v903_v33 = vadd.f32 %v902_v26, %v782_v19  ;;  %v1933_v19 = vld [vmem:[%s2624_s9 + $0x8] sm:$0xff]  }
 0x3d1   : > { %v1142_v25 = vpop.xlane.xlu0 %1141  ;;  %v1148_v37 = vpop.permute.xlu1 %1147 }
 0x3d2   : > { %1950 = vrcp.f32 %v1142_v25  ;;  %v1153_v41 = vsel %vm792_vm4, %v1148_v37, 0  ;;  %v1680_v25 = vld [vmem:[%s2626_s11] ss:$0 sm:$0xff] }
 0x3d4   : > { %v1949_v28 = vpop.eup %1948 }
 0x3d5   : > { %v906_v27 = vpop.permute.xlu0 %905  ;;  %v1023_v31 = vmul.f32 %v1949_v28, %v1941_v11 }
 0x3d6   : > { %v911_v29 = vsel %vm792_vm4, %v906_v27, 0  ;;  %v1681_v27 = vld [vmem:[%s2627_s12] ss:$0 sm:$0xff] }
 0x3d7   : > { %1768 = vmatpush3.bf16.msra.mxu1 %v911_v29  ;;  %v1024_v35 = vadd.f32 %v1023_v31, %v903_v33  ;;  %v1025_v39 = vpack.c.bf16 %v1023_v31, %v1023_v31  ;;  %v1935_v31 = vld [vmem:[%s2624_s9 + $0x18] sm:$0xff]  }
 0x3d8   : > { %1779 = vmatprep.subr.bf16.mxu1 %v2136_v0 }
 0x3da   : > { %1770 = vmatmul.mubr.msk.bf16.vlgmr.msra.gmra.mrb[12].mxu1 %vm725_vm3, %v904_v30  ;;  %v1934_v30 = vld [vmem:[%s2624_s9 + $0x10] sm:$0xff]  }
 0x3db   : > { %1780 = vmatpush3.bf16.msra.mxu1 %v1032_v32  ;;  %1781 = vmatprep.mubr.msk.bf16.mxu1 %vm2137_vm0, %v2136_v0  ;;  %v1682_v32 = vld [vmem:[%s2623_s8] ss:$0 sm:$0xff] }
 0x3dc   : > { %v1951_v34 = vpop.eup %1950  ;;  %1791 = vmatprep.subr.bf16.mxu1 %v2136_v0 }
 0x3dd   : > { %v1144_v36 = vmul.f32 %v1951_v34, %v1943_v13 }
 0x3df   : > { %v1145_v38 = vadd.f32 %v1144_v36, %v1024_v35  ;;  %v1146_v42 = vpack.c.bf16 %v1144_v36, %v1144_v36 }
 0x3e1   : > { %v1201_v40 = vmul.f32 0.25, %v1145_v38 }
 0x3e2   : > { %1782 = vmatmul.mubr.msk.bf16.vlgmr.msra.gmra.mrb[16].mxu1 %vm725_vm3, %v1025_v39 }
 0x3e3   : > { %1792 = vmatpush3.bf16.msra.mxu1 %v1153_v41  ;;  %1793 = vmatprep.mubr.msk.bf16.mxu1 %vm2137_vm0, %v2136_v0  ;;  %1202 = vst.msk [vmem:[%s2475_s28] sm:$0xff] %vm725_vm3, %v1201_v40 }
 0x3e4   : > { %1805 = vmatprep.subr.bf16.mxu1 %v2136_v0 }
 0x3ea   : > { %1794 = vmatmul.mubr.msk.bf16.vlgmr.msra.gmra.mrb[20].mxu1 %vm725_vm3, %v1146_v42 }
 0x3eb   : > { %1809 = vmatprep.mubr.msk.bf16.mxu1 %vm2137_vm0, %v2136_v0  ;;  %1806 = vmatpush3.bf16.msra.mxu1 %v1930_v17 }
 0x3ec   : > { %1807 = vmatprep.subr.bf16.mxu1 %v2136_v0 }
 0x3ef   : > { %1808 = vmatpush3.bf16.msra.mxu1 %v1931_v18 }
 0x42f   : > { %v830_v43 = vpop.f32.mrb[8].mxu1 }
 0x430   : > { %836 = vst.msk [vmem:[#allocation3] sm:$0xff] %vm725_vm3, %v830_v43  ;;  %v1759_v44 = vpop.f32.mrb[9].mxu1 }
 0x431   : > { %v833_v45 = vpop.f32.mrb[10].mxu1 }
 0x432   : > { %v1760_v46 = vpop.f32.mrb[11].mxu1 }
 0x4ad   : > { %v947_v47 = vpop.f32.mrb[12].mxu1 }
 0x4ae   : > { %954 = vrot.lane.b32.xlu0 %v947_v47, %s2145_s30  ;;  %v1771_v48 = vpop.f32.mrb[13].mxu1  ;;  %s1519_s30 = sshll.u32 %s2475_s28, 4  ;;  %s1520_s30 = int_to_ptr.vmem [resolvable:$true] %s1519_s30 }
 0x4af   : > { %v950_v49 = vpop.f32.mrb[14].mxu1  ;;  %p2019_p2 = scmp.lt.s32.totalorder %s1520_s30, %s2017_s16 }
 0x4b0   : > { %v1772_v50 = vpop.f32.mrb[15].mxu1 }
 0x4b5   : > { %v1068_v53 = vpop.f32.mrb[16].mxu1 }
 0x4b6   : > { %1075 = vrot.lane.b32.xlu1 %v1068_v53, %s2146_s17  ;;  %v1783_v54 = vpop.f32.mrb[17].mxu1  ;;  %s1491_s17 = scalar_lea.sflag [#allocation11], %s2463_s19 }
 0x4b7   : > { %v1071_v55 = vpop.f32.mrb[18].mxu1 }
 0x4b8   : > { %v1784_v56 = vpop.f32.mrb[19].mxu1 }
 0x4bd   : > { %v1189_v57 = vpop.f32.mrb[20].mxu1 }
 0x4be   : > { %1196 = vrot.lane.b32.xlu0 %v1189_v57, %s2147_s13  ;;  %v1795_v58 = vpop.f32.mrb[21].mxu1  ;;  %s2012_s13 = scalar_lea.vmem %s1520_s30, 128 }
 0x4bf   : > { %v1192_v59 = vpop.f32.mrb[22].mxu1  ;;  %p2013_p13 = scmp.ne.s32.totalorder %s1520_s30, %s2012_s13  ;;  %p2020_p3 = scmp.lt.s32.totalorder %s2018_s25, %s2012_s13 }
 0x4c0   : > { %v1796_v60 = vpop.f32.mrb[23].mxu1 }
 0x4c1   : > { %p2014_p10 = pnand %p2013_p13, %p2666_p8  ;;  %p2021_p5 = por %p2020_p3, %p2019_p2 }
 0x4c3   : > { %p2015_p11 = pneg %p2014_p10 }
 0x4c5   : > { %p2022_p6 = pnand %p2021_p5, %p2015_p11 }
 0x520   : > { %v955_v61 = vpop.permute.xlu0 %954 }
 0x521   : > { %958 = vst.msk [vmem:[#allocation3] sm:$0xff] %vm957_vm5, %v955_v61 }
 0x528   : > { %v1076_v62 = vpop.permute.xlu1 %1075 }
 0x529   : > { %1079 = vst.msk [vmem:[#allocation3] sm:$0xff] %vm1078_vm6, %v1076_v62 }
 0x530   : > { %v1197_v63 = vpop.permute.xlu0 %1196 }
 0x531   : > { %1200 = vst.msk [vmem:[#allocation3] sm:$0xff] %vm1199_vm7, %v1197_v63 }
 0x538   : > { %v1203_v1 = vld [vmem:[#allocation3] sm:$0xff] }
 0x539   : > { %v1204_v2 = vpack.c.bf16 %v1203_v1, %v1203_v1 }
 0x53b   : > { %1802 = vmatmul.mubr.msk.bf16.vlgmr.msra.gmra.mrb[16].mxu0 %vm604_vm1, %v1204_v2 }
 0x53c   : > { %1821 = vmatprep.mubr.msk.bf16.mxu0 %vm2137_vm0, %v2136_v0 }
 0x60e   : > { %v1265_v5 = vpop.f32.mrb[16].mxu0 }
 0x60f   : > { %v1266_v6 = vadd.f32 %v1676_v4, %v1265_v5  ;;  %v1803_v7 = vpop.f32.mrb[17].mxu0 }
 0x610   : > { %v1268_v8 = vpop.f32.mrb[18].mxu0 }
 0x611   : > { %v1804_v9 = vpop.f32.mrb[19].mxu0  ;;  %v1271_v10 = vadd.f32 %v1266_v6, %v2382_v3  ;;  %v1932_v3 = vld [vmem:[%s2624_s9] sm:$0xff]  }
 0x612   : > { %1814 = vmatpush3.bf16.msra.mxu0 %v1932_v3 }
 0x613   : > { %v1272_v11 = vsel %vm604_vm1, %v1271_v10, 0.0  ;;  %1815 = vmatprep.subr.bf16.mxu0 %v2136_v0 }
 0x614   : > { %1273 = vadd.xlane.f32.xlu1 %v1272_v11 }
 0x616   : > { %1816 = vmatpush3.bf16.msra.mxu0 %v1933_v19 }
 0x617   : > { %1817 = vmatprep.subr.bf16.mxu0 %v2136_v0 }
 0x61a   : > { %1818 = vmatpush3.bf16.msra.mxu0 %v1934_v30 }
 0x61b   : > { %1819 = vmatprep.subr.bf16.mxu0 %v2136_v0  ;;  %v1686_v0 = vld [vmem:[%s2625_s10] ss:$0 sm:$0xff] }
 0x61e   : > { %1820 = vmatpush3.bf16.msra.mxu0 %v1935_v31 }
 0x6a1   : > { %v1274_v12 = vpop.xlane.xlu1 %1273 }
 0x6a2   : > { %v1276_v13 = vmul.f32 0.03125, %v1274_v12 }
 0x6a4   : > { %v1277_v14 = vsub.f32 %v1271_v10, %v1276_v13 }
 0x6a6   : > { %v1278_v15 = vmul.f32 %v1277_v14, %v1277_v14 }
 0x6a8   : > { %v1279_v16 = vsel %vm604_vm1, %v1278_v15, 0.0 }
 0x6a9   : > { %1280 = vadd.xlane.f32.xlu0 %v1279_v16 }
 0x736   : > { %v1281_v20 = vpop.xlane.xlu0 %1280 }
 0x737   : > { %v1282_v21 = vmul.f32 0.03125, %v1281_v20 }
 0x739   : > { %v1283_v22 = vadd.f32 1e-05, %v1282_v21 }
 0x73b   : > { %1952 = vrsqrt.f32 %v1283_v22 }
 0x745   : > { %v1953_v23 = vpop.eup %1952 }
 0x746   : > { %v1285_v26 = vmul.f32 %v1953_v23, %v1277_v14 }
 0x748   : > { %v1293_v28 = vmul.f32 %v1680_v25, %v1285_v26 }
 0x74a   : > { %v1301_v29 = vadd.f32 %v1681_v27, %v1293_v28 }
 0x74c   : > { %v1302_v24 = vpack.c.bf16 %v1301_v29, %v1301_v29 }
 0x74e   : > { %1810 = vmatmul.mubr.msk.bf16.vlgmr.msra.gmra.mrb[24].mxu1 %vm604_vm1, %v1302_v24 }
 0x821   : > { %v1363_v33 = vpop.f32.mrb[24].mxu1 }
 0x822   : > { %v1364_v34 = vadd.f32 %v1682_v32, %v1363_v33  ;;  %v1811_v35 = vpop.f32.mrb[25].mxu1 }
 0x823   : > { %v1366_v36 = vpop.f32.mrb[26].mxu1 }
 0x824   : > { %v1369_v37 = vmax.f32 %v1364_v34, 0.0  ;;  %v1812_v38 = vpop.f32.mrb[27].mxu1 }
 0x826   : > { %v1370_v39 = vpack.c.bf16 %v1369_v37, %v1369_v37 }
 0x828   : > { %1822 = vmatmul.mubr.msk.bf16.vlgmr.msra.gmra.mrb[20].mxu0 %vm1410_vm8, %v1370_v39 }
 0x8fb   : > { %v1448_v40 = vpop.f32.mrb[20].mxu0 }
 0x8fc   : > { %v1449_v41 = vadd.f32 %v1686_v0, %v1448_v40  ;;  %v1823_v42 = vpop.f32.mrb[21].mxu0 }
 0x8fd   : > { %v1451_v43 = vpop.f32.mrb[22].mxu0 }
 0x8fe   : > { %v1824_v44 = vpop.f32.mrb[23].mxu0  ;;  %v1454_v45 = vadd.f32 %v1449_v41, %v1301_v29 }
 0x900   : > { %v1455_v46 = vsel %vm604_vm1, %v1454_v45, 0.0 }
 0x901   : > { %1456 = vadd.xlane.f32.xlu0 %v1455_v46 }
 0x98e   : > { %v1457_v47 = vpop.xlane.xlu0 %1456 }
 0x98f   : > { %v1458_v48 = vmul.f32 0.03125, %v1457_v47 }
 0x991   : > { %v1459_v49 = vsub.f32 %v1454_v45, %v1458_v48 }
 0x993   : > { %v1460_v50 = vmul.f32 %v1459_v49, %v1459_v49 }
 0x995   : > { %v1461_v51 = vsel %vm604_vm1, %v1460_v50, 0.0 }
 0x996   : > { %1462 = vadd.xlane.f32.xlu1 %v1461_v51 }
 0x997   : > { %2025 = shalt.err (!%p2022_p6)
}
 0x998   : > { %s2026_s28 = scalar_lea.hbm %s2532_s23, 128  ;;  %s2030_s26 = scalar_lea.hbm %s2665_s15, 256 }
 0x999   : > { %p2027_p7 = scmp.ne.s32.totalorder %s2532_s23, %s2026_s28  ;;  %p2031_p0 = scmp.lt.u32.totalorder %s2532_s23, %s2665_s15 }
 0x99a   : > { %p2032_p4 = scmp.lt.u32.totalorder %s2030_s26, %s2026_s28  ;;  %p2034_p13 = scmp.lt.u32.totalorder %s2026_s28, %s2532_s23 }
 0x99b   : > { %p2028_p9 = pnand %p2027_p7, %p2666_p8 }
 0x99c   : > { %p2033_p1 = por %p2032_p4, %p2031_p0 }
 0x99d   : > { %p2029_p12 = pneg %p2028_p9 }
 0x99e   : > { %p2035_p10 = por %p2034_p13, %p2033_p1 }
 0x9a0   : > { %p2036_p11 = pnand %p2035_p10, %p2029_p12 }
 0x9a2   : > { %2039 = shalt.err (!%p2036_p11)
}
 0x9a3   : > { %1834 = dma.vmem_to_hbm [thread:$0]  (%p2666_p8), %s1520_s30, 128, %s2532_s23, %s1491_s17  }
 0x9a4   : > { %s2667_s25 = sld [smem:[#allocation24_spill]]  ;;  %s2668_s21 = sld [smem:[#allocation25_spill]] }
 0x9a5   : > { %s562_s26 = scalar_lea.vmem [#allocation9], %s1653_s27  ;;  %s2669_s17 = sld [smem:[#allocation26_spill]] }
 0x9a6   : > { %s1505_s18 = sshll.u32 %s562_s26, 4  ;;  %s1486_s13 = scalar_lea.sflag [#allocation6], %s2463_s19  ;;  %s2568_s18 = int_to_ptr.vmem [resolvable:$true] %s1505_s18 }
 0x9a7   : > { %s2040_s16 = scalar_lea.vmem %s2568_s18, 128  ;;  %s2149_s27 = smov [#allocation9]  }
 0x9a8   : > { %p2041_p2 = scmp.ne.s32.totalorder %s2568_s18, %s2040_s16  ;;  %s2044_s24 = sshll.u32 %s2149_s27, 4  ;;  %s2045_s24 = int_to_ptr.vmem [resolvable:$false] %s2044_s24 }
 0x9a9   : > { %p2047_p6 = scmp.lt.s32.totalorder %s2568_s18, %s2045_s24 }
 0x9aa   : > { %v1692_v56 = vld [vmem:[%s2667_s25] ss:$0 sm:$0xff]  ;;  %p2042_p3 = pnand %p2041_p2, %p2666_p8  ;;  %s2046_s25 = scalar_lea.vmem %s2045_s24, 256 }
 0x9ab   : > { %v1693_v58 = vld [vmem:[%s2668_s21] ss:$0 sm:$0xff]  ;;  %s2566_s14 = scalar_lea.hbm %s2669_s17, %s1696_s20  ;;  %p2048_p7 = scmp.lt.s32.totalorder %s2046_s25, %s2040_s16 }
 0x9ac   : > { %p2043_p5 = pneg %p2042_p3 }
 0x9ad   : > { %p2049_p9 = por %p2048_p7, %p2047_p6 }
 0x9af   : > { %p2050_p12 = pnand %p2049_p9, %p2043_p5 }
 0xa23   : > { %v1463_v52 = vpop.xlane.xlu1 %1462 }
 0xa24   : > { %v1464_v53 = vmul.f32 0.03125, %v1463_v52 }
 0xa26   : > { %v1465_v54 = vadd.f32 1e-05, %v1464_v53 }
 0xa28   : > { %1954 = vrsqrt.f32 %v1465_v54 }
 0xa32   : > { %v1955_v55 = vpop.eup %1954 }
 0xa33   : > { %v1467_v57 = vmul.f32 %v1955_v55, %v1459_v49 }
 0xa35   : > { %v1475_v59 = vmul.f32 %v1692_v56, %v1467_v57 }
 0xa37   : > { %v1483_v60 = vadd.f32 %v1693_v58, %v1475_v59 }
 0xa39   : > { %1484 = vst.msk [vmem:[%s562_s26] sm:$0xff] %vm604_vm1, %v1483_v60 }
 0xa3a   : > { %2053 = shalt.err (!%p2050_p12)
}
 0xa3b   : > { %s2054_s19 = scalar_lea.hbm %s2566_s14, 128  ;;  %s2058_s29 = scalar_lea.hbm %s2669_s17, 256 }
 0xa3c   : > { %p2055_p0 = scmp.ne.s32.totalorder %s2566_s14, %s2054_s19  ;;  %p2059_p13 = scmp.lt.u32.totalorder %s2566_s14, %s2669_s17 }
 0xa3d   : > { %p2060_p10 = scmp.lt.u32.totalorder %s2058_s29, %s2054_s19  ;;  %p2062_p2 = scmp.lt.u32.totalorder %s2054_s19, %s2566_s14 }
 0xa3e   : > { %p2056_p4 = pnand %p2055_p0, %p2666_p8 }
 0xa3f   : > { %p2061_p11 = por %p2060_p10, %p2059_p13 }
 0xa40   : > { %p2057_p1 = pneg %p2056_p4 }
 0xa41   : > { %p2063_p3 = por %p2062_p2, %p2061_p11 }
 0xa43   : > { %p2064_p5 = pnand %p2063_p3, %p2057_p1 }
 0xa45   : > { %2067 = shalt.err (!%p2064_p5)
}
 0xa46   : > { %1833 = dma.vmem_to_hbm [thread:$0]  (%p2666_p8), %s2568_s18, 128, %s2566_s14, %s1486_s13  }
 0xa47 PF: > { %s2670_s23 = sld [smem:[#allocation19_spill]]  ;;  %s2671_s30 = sld [smem:[#allocation16_spill]] }
 0xa48   : > { %s2672_s16 = sld [smem:[#allocation21_spill]] }
 0xa4d   : > { %p1855_p6 = scmp.ge.s32.totalorder %s2670_s23, 2  ;;  %s1531_s27 = sand.u32 1, %s2671_s30  }
 0xa4e   : > { %p2673_p7 = scmp.ne.s32.totalorder %s2672_s16, 0  ;;  %s1532_s24 = scalar_lea.sflag [#allocation6], %s1531_s27 }
 0xa50   : > { %p1845_p9 = pnand %p1855_p6, %p2673_p7 }
 0xa52   : > { %2101 = dma.done.wait (!%p1845_p9), %s1532_s24, 128  }
 0xa53   : > { %2103 = vsyncadd (!%p1845_p9), %s1532_s24, 4294967168  ;;  %s1541_s25 = scalar_lea.sflag [#allocation11], %s1531_s27 }
 0xa54   : > { %2105 = dma.done.wait (!%p1845_p9), %s1541_s25, 128  }
 0xa55   : > { %2107 = vsyncadd (!%p1845_p9), %s1541_s25, 4294967168  ;;  %s35_s26 = sadd.s32 1, %s2670_s23   ;;  %s2674_s0 = sld [smem:[#allocation17_spill]] }
 0xa56   : > { %p32_p12 = scmp.ge.s32.totalorder %s35_s26, 4   ;;  %s2675_s23 = sld [smem:[#allocation22_spill]] }
 0xa57   : > { %s2676_s24 = sld [smem:[#allocation18_spill]]  ;;  %s2677_s25 = sld [smem:[#allocation20_spill]] }
 0xa58   : > { %s2678_s21 = smov %s2114_s22  ;;  %34 = sbr.rel (!%p32_p12) target bundleno = 14 (0xe), region = 146 }
 0xa5b   : > { %s2679_s22 = smov %s2674_s0 }
 0xa5f   :  { %1546 = vsyncpa [#allocation5], 1 }
 0xa60   :  { %1548 = vsyncpa [#allocation5 + $0x1], 1 }
 0xa61   :  { %1549 = vsyncpa [#allocation8], 1 }
 0xa62   :  { %1550 = vsyncpa [#allocation6], 1 }
 0xa63   :  { %1552 = vsyncpa [#allocation6 + $0x1], 1 }
 0xa64   :  { %1553 = vsyncpa [#allocation11], 1 }
 0xa65   :  { %1555 = vsyncpa [#allocation11 + $0x1], 1 }

</bundles_post_ra>
